<compile_context>
chip_gen: v5e
topology: v5e:2x2
jax: 0.10.0
libtpu: 0.0.40
codegen_flags: <defaults>
</compile_context>

<pallas_src>
import functools

import jax
import jax.numpy as jnp
from jax.experimental import pallas as pl
from jax.experimental.pallas import tpu as pltpu


def _round_up(v, m):
    return m * ((v + m - 1) // m)


def _ffn_kernel(x_ref, wgu_ref, wd_ref, o_ref, acc_ref, *, ti):
    """One (tm, H) token tile x one ti-slice of the intermediate dimension.

    x_ref:   (tm, H)       token tile (re-used across the I axis)
    wgu_ref: (H, 2*ti)     fused [gate_j | up_j] weight slice
    wd_ref:  (ti, H)       down_proj weight slice
    o_ref:   (tm, H)       output tile (resident across the I axis)
    acc_ref: (tm, H) f32   VMEM accumulator
    """
    j = pl.program_id(1)

    @pl.when(j == 0)
    def _():
        acc_ref[...] = jnp.zeros_like(acc_ref)

    x = x_ref[...]
    # Single fused MXU matmul producing [gate_j | up_j] with f32 accumulation.
    gu = jnp.dot(x, wgu_ref[...], preferred_element_type=jnp.float32)
    gate = gu[:, :ti]
    up = gu[:, ti:]
    # SiLU in f32 on the (tm, ti) tile; exp lands on the EUP slot.
    h = (gate * jax.nn.sigmoid(gate)) * up
    acc_ref[...] += jnp.dot(h.astype(wd_ref.dtype), wd_ref[...],
                            preferred_element_type=jnp.float32)

    @pl.when(j == pl.num_programs(1) - 1)
    def _():
        o_ref[...] = acc_ref[...].astype(o_ref.dtype)


@functools.partial(jax.jit, static_argnames=("tm", "ti"))
def deepseek_v3_ffn(x, wg_t, wu_t, wd_t, *, tm=256, ti=256):
    """SwiGLU FFN forward.

    x:    [B, S, H]
    wg_t: [H, I]   gate_proj weight, transposed vs. torch's [out, in]
    wu_t: [H, I]   up_proj weight, transposed
    wd_t: [I, H]   down_proj weight, transposed
    returns [B, S, H]
    """
    B, S, H = x.shape
    I = wg_t.shape[1]
    M = B * S

    if ti % 128 != 0:
        raise ValueError("ti must be a multiple of 128")
    sublane = 16 if x.dtype == jnp.bfloat16 else 8
    if tm % sublane != 0:
        raise ValueError(f"tm must be a multiple of {sublane} for dtype {x.dtype}")

    Mp = _round_up(M, tm)
    Ip = _round_up(I, ti)

    x2d = x.reshape(M, H)
    if Mp != M:
        x2d = jnp.pad(x2d, ((0, Mp - M), (0, 0)))
    if Ip != I:
        # Zero-padding the intermediate dim is exact: silu(0)*0 = 0 and padded
        # rows of Wd are zero, so padded columns contribute nothing.
        wg_t = jnp.pad(wg_t, ((0, 0), (0, Ip - I)))
        wu_t = jnp.pad(wu_t, ((0, 0), (0, Ip - I)))
        wd_t = jnp.pad(wd_t, ((0, Ip - I), (0, 0)))

    # Fuse gate|up per ti-block: wgu[:, j*2ti:(j+1)*2ti] = [Wg_j | Wu_j].
    nb = Ip // ti
    wgu = jnp.concatenate(
        [wg_t.reshape(H, nb, ti), wu_t.reshape(H, nb, ti)], axis=2
    ).reshape(H, 2 * Ip)

    itemsize = jnp.dtype(x.dtype).itemsize
    # double-buffered x / wgu / wd / out tiles + f32 accumulator
    est_vmem = (2 * (tm * H + H * 2 * ti + ti * H + tm * H) * itemsize
                + tm * H * 4)
    vmem_limit = int(min(max(2 * est_vmem, 32 * 1024 * 1024),
                         56 * 1024 * 1024))

    out2d = pl.pallas_call(
        functools.partial(_ffn_kernel, ti=ti),
        out_shape=jax.ShapeDtypeStruct((Mp, H), x.dtype),
        grid_spec=pltpu.PrefetchScalarGridSpec(
            num_scalar_prefetch=0,
            grid=(Mp // tm, Ip // ti),               # (M parallel, I reduction last)
            in_specs=[
                pl.BlockSpec((tm, H), lambda i, j: (i, 0)),        # x tile
                pl.BlockSpec((H, 2 * ti), lambda i, j: (0, j)),    # [gate|up] slice
                pl.BlockSpec((ti, H), lambda i, j: (j, 0)),        # down slice
            ],
            out_specs=pl.BlockSpec((tm, H), lambda i, j: (i, 0)),
            scratch_shapes=[pltpu.VMEM((tm, H), jnp.float32)],
        ),
        compiler_params=pltpu.CompilerParams(
            dimension_semantics=("parallel", "arbitrary"),
            vmem_limit_bytes=vmem_limit,
        ),
    )(x2d, wgu, wd_t)

    return out2d[:M].reshape(B, S, H)


def _reference(x, wg_t, wu_t, wd_t):
    """Pure-JAX reference with the same dtype pipeline as the kernel."""
    gate = jnp.einsum("bsh,hi->bsi", x, wg_t, preferred_element_type=jnp.float32)
    up = jnp.einsum("bsh,hi->bsi", x, wu_t, preferred_element_type=jnp.float32)
    h = (jax.nn.silu(gate) * up).astype(wd_t.dtype)
    out = jnp.einsum("bsi,ih->bsh", h, wd_t, preferred_element_type=jnp.float32)
    return out.astype(x.dtype)


if __name__ == "__main__":
    # Small-but-representative shapes: exercises 2 M-tiles and 4 I-steps.
    batch, seq = 2, 128
    hidden_size = 256
    intermediate_size = 500
    multiple_of = 64
    intermediate_size = multiple_of * (
        (intermediate_size + multiple_of - 1) // multiple_of)  # -> 512

    key = jax.random.PRNGKey(0)
    kx, kg, ku, kd = jax.random.split(key, 4)

    x_f32 = jax.random.normal(kx, (batch, seq, hidden_size), dtype=jnp.float32)
    wg_f32 = (jax.random.normal(kg, (hidden_size, intermediate_size),
                                dtype=jnp.float32) * hidden_size ** -0.5)
    wu_f32 = (jax.random.normal(ku, (hidden_size, intermediate_size),
                                dtype=jnp.float32) * hidden_size ** -0.5)
    wd_f32 = (jax.random.normal(kd, (intermediate_size, hidden_size),
                                dtype=jnp.float32) * intermediate_size ** -0.5)

    # --- f32 run ---
    out_f32 = deepseek_v3_ffn(x_f32, wg_f32, wu_f32, wd_f32, tm=128, ti=128)
    out_f32 = jax.block_until_ready(out_f32)
    ref_f32 = _reference(x_f32, wg_f32, wu_f32, wd_f32)
    assert out_f32.shape == (batch, seq, hidden_size)
    assert jnp.allclose(out_f32, ref_f32, atol=2e-2, rtol=2e-2), \
        "f32 mismatch vs reference"

    # --- bf16 run (preferred MXU path: bf16 operands, f32 accumulation) ---
    x_bf = x_f32.astype(jnp.bfloat16)
    wg_bf = wg_f32.astype(jnp.bfloat16)
    wu_bf = wu_f32.astype(jnp.bfloat16)
    wd_bf = wd_f32.astype(jnp.bfloat16)
    out_bf = deepseek_v3_ffn(x_bf, wg_bf, wu_bf, wd_bf, tm=128, ti=128)
    out_bf = jax.block_until_ready(out_bf)
    ref_bf = _reference(x_bf, wg_bf, wu_bf, wd_bf)
    assert jnp.allclose(out_bf.astype(jnp.float32), ref_bf.astype(jnp.float32),
                        atol=2e-2, rtol=2e-2), "bf16 mismatch vs reference"

    print("KERNEL_OK")
</pallas_src>

<mosaic_0001>
module attributes {stable_mosaic.version = 11 : i64} {
  func.func @_ffn_kernel(%arg0: i32, %arg1: i32, %arg2: memref<128x256xf32, #tpu.memory_space<vmem>>, %arg3: memref<256x256xf32, #tpu.memory_space<vmem>>, %arg4: memref<128x256xf32, #tpu.memory_space<vmem>>, %arg5: memref<128x256xf32, #tpu.memory_space<vmem>>, %arg6: memref<128x256xf32, #tpu.memory_space<vmem>>) attributes {dimension_semantics = [#tpu.dimension_semantics<parallel>, #tpu.dimension_semantics<arbitrary>], iteration_bounds = array<i64: 2, 4>, scalar_prefetch = 0 : i64, scratch_operands = 1 : i64, tpu.core_type = #tpu.core_type<tc>, window_params = [{transform_indices = @transform_0, window_bounds = array<i64: 128, 256>}, {transform_indices = @transform_1, window_bounds = array<i64: 256, 256>}, {transform_indices = @transform_2, window_bounds = array<i64: 128, 256>}, {transform_indices = @transform_3, window_bounds = array<i64: 128, 256>}]} {
    %c0_i32 = arith.constant 0 : i32
    %0 = arith.cmpi eq, %arg1, %c0_i32 : i32
    %1 = arith.extui %0 : i1 to i32
    %c0_i32_0 = arith.constant 0 : i32
    %2 = arith.cmpi ne, %1, %c0_i32_0 : i32
    scf.if %2 {
      %cst_13 = arith.constant 0.000000e+00 : f32
      %23 = vector.broadcast %cst_13 : f32 to vector<128x256xf32>
      %c0_14 = arith.constant 0 : index
      %c0_15 = arith.constant 0 : index
      %24 = vector.load %arg6[%c0_14, %c0_15] : memref<128x256xf32, #tpu.memory_space<vmem>>, vector<128x256xf32>
      tpu.vector_store %arg6[%c0_14, %c0_15], %23 {strides = array<i32>} : memref<128x256xf32, #tpu.memory_space<vmem>>, vector<128x256xf32>,
    } else {
    }
    %c0 = arith.constant 0 : index
    %c0_1 = arith.constant 0 : index
    %3 = vector.load %arg2[%c0, %c0_1] : memref<128x256xf32, #tpu.memory_space<vmem>>, vector<128x256xf32>
    %c0_2 = arith.constant 0 : index
    %c0_3 = arith.constant 0 : index
    %4 = vector.load %arg3[%c0_2, %c0_3] : memref<256x256xf32, #tpu.memory_space<vmem>>, vector<256x256xf32>
    %cst = arith.constant dense<0.000000e+00> : vector<128x256xf32>
    %5 = tpu.matmul %3, %4, %cst {dimension_numbers = #tpu.dot_dimension_numbers<[1], [0], [0], [1], [0, 0, 1, 1], [], []>} : vector<128x256xf32>, vector<256x256xf32>, vector<128x256xf32> -> vector<128x256xf32>
    %6 = vector.extract_strided_slice %5 {offsets = [0, 0], sizes = [128, 128], strides = [1, 1]} : vector<128x256xf32> to vector<128x128xf32>
    %7 = vector.extract_strided_slice %5 {offsets = [0, 128], sizes = [128, 128], strides = [1, 1]} : vector<128x256xf32> to vector<128x128xf32>
    %8 = arith.negf %6 : vector<128x128xf32>
    %9 = math.exp %8 : vector<128x128xf32>
    %cst_4 = arith.constant 1.000000e+00 : f32
    %10 = vector.broadcast %cst_4 : f32 to vector<128x128xf32>
    %11 = arith.addf %10, %9 : vector<128x128xf32>
    %12 = arith.divf %10, %11 : vector<128x128xf32>
    %13 = arith.mulf %6, %12 : vector<128x128xf32>
    %14 = arith.mulf %13, %7 : vector<128x128xf32>
    %c0_5 = arith.constant 0 : index
    %c0_6 = arith.constant 0 : index
    %15 = vector.load %arg6[%c0_5, %c0_6] : memref<128x256xf32, #tpu.memory_space<vmem>>, vector<128x256xf32>
    %c0_7 = arith.constant 0 : index
    %c0_8 = arith.constant 0 : index
    %16 = vector.load %arg4[%c0_7, %c0_8] : memref<128x256xf32, #tpu.memory_space<vmem>>, vector<128x256xf32>
    %cst_9 = arith.constant dense<0.000000e+00> : vector<128x256xf32>
    %17 = tpu.matmul %14, %16, %cst_9 {dimension_numbers = #tpu.dot_dimension_numbers<[1], [0], [0], [1], [0, 0, 1, 1], [], []>} : vector<128x128xf32>, vector<128x256xf32>, vector<128x256xf32> -> vector<128x256xf32>
    %18 = arith.addf %15, %17 : vector<128x256xf32>
    %c0_10 = arith.constant 0 : index
    %c0_11 = arith.constant 0 : index
    %19 = vector.load %arg6[%c0_10, %c0_11] : memref<128x256xf32, #tpu.memory_space<vmem>>, vector<128x256xf32>
    tpu.vector_store %arg6[%c0_10, %c0_11], %18 {strides = array<i32>} : memref<128x256xf32, #tpu.memory_space<vmem>>, vector<128x256xf32>,
    %c3_i32 = arith.constant 3 : i32
    %20 = arith.cmpi eq, %arg1, %c3_i32 : i32
    %21 = arith.extui %20 : i1 to i32
    %c0_i32_12 = arith.constant 0 : i32
    %22 = arith.cmpi ne, %21, %c0_i32_12 : i32
    scf.if %22 {
      %c0_13 = arith.constant 0 : index
      %c0_14 = arith.constant 0 : index
      %23 = vector.load %arg6[%c0_13, %c0_14] : memref<128x256xf32, #tpu.memory_space<vmem>>, vector<128x256xf32>
      %c0_15 = arith.constant 0 : index
      %c0_16 = arith.constant 0 : index
      %24 = vector.load %arg5[%c0_15, %c0_16] : memref<128x256xf32, #tpu.memory_space<vmem>>, vector<128x256xf32>
      tpu.vector_store %arg5[%c0_15, %c0_16], %23 {strides = array<i32>} : memref<128x256xf32, #tpu.memory_space<vmem>>, vector<128x256xf32>,
    } else {
    }
    return
  }
  func.func @transform_0(%arg0: i32, %arg1: i32) -> (i32, i32) {
    %c0_i32 = arith.constant 0 : i32
    %c0_i32_0 = arith.constant 0 : i32
    return %arg0, %c0_i32 : i32, i32
  }
  func.func @transform_1(%arg0: i32, %arg1: i32) -> (i32, i32) {
    %c0_i32 = arith.constant 0 : i32
    %c0_i32_0 = arith.constant 0 : i32
    return %c0_i32, %arg1 : i32, i32
  }
  func.func @transform_2(%arg0: i32, %arg1: i32) -> (i32, i32) {
    %c0_i32 = arith.constant 0 : i32
    %c0_i32_0 = arith.constant 0 : i32
    return %arg1, %c0_i32 : i32, i32
  }
  func.func @transform_3(%arg0: i32, %arg1: i32) -> (i32, i32) {
    %c0_i32 = arith.constant 0 : i32
    %c0_i32_0 = arith.constant 0 : i32
    return %arg0, %c0_i32 : i32, i32
  }
}

</mosaic_0001>

<bundles_post_ra>
// kernel: deepseek_v3_ffn.1
= control target key start
LH: loop header
LB: loop body
LE: loop exit
PB: predicated region body
PF: predicated region fallthrough
CT: control target
= control target key end

     0   :  { %s2780_s0 = inlined_call_operand.vmem [shape: f32[256,256], index: 0, kind: input, shape index: {}]   ;;  %s2781_s1 = inlined_call_operand.vmem [shape: f32[256,1024], index: 1, kind: input, shape index: {}]   ;;  %s2782_s2 = inlined_call_operand.vmem [shape: f32[512,256], index: 2, kind: input, shape index: {}]   ;;  %s2783_s3 = inlined_call_operand.hbm [shape: f32[256,256], index: 3, kind: output, shape index: {}]  }
   0x1   :  { %2786 = sst [smem:[#allocation8_spill]] %s2781_s1 }
   0x2   :  { %8 = vsyncpa [#allocation5], 0 }
   0x3   :  { %10 = vsyncpa [#allocation5 + $0x1], 0  ;;  %s1919_s12 = smov 0   ;;  %s1921_s13 = smov 0  }
   0x4   :  { %s1923_s14 = smov 0   ;;  %s1925_s15 = smov 0  }
   0x5   :  { %s1927_s16 = smov 0   ;;  %s1929_s17 = smov 0  }
   0x6   :  { %s1931_s18 = smov 0   ;;  %s1933_s19 = smov 0  }
   0x7   :  { %s1935_s20 = smov 0   ;;  %s1937_s21 = smov 0  }
   0x8 LB: > { %s1553_s22 = sadd.s32 4294967295, %s1894_s21   ;;  %s1554_s23 = sadd.s32 4294967294, %s1894_s21   ;;  %s1894_s21 = sphi %s1937_s21, %s16_s21   ;;  %s1890_s20 = sphi %s1935_s20, %s2818_s20   ;;  %s1886_s19 = sphi %s1933_s19, %s2817_s19   ;;  %s1882_s18 = sphi %s1931_s18, %s2816_s18   ;;  %s1878_s17 = sphi %s1929_s17, %s2815_s17   ;;  %s1874_s16 = sphi %s1927_s16, %s2814_s16   ;;  %s1870_s15 = sphi %s1925_s15, %s2813_s15   ;;  %s1866_s14 = sphi %s1923_s14, %s2812_s14   ;;  %s1862_s13 = sphi %s1921_s13, %s2811_s13   ;;  %s1858_s12 = sphi %s1919_s12, %s2810_s12  }
   0x9   : > { %s25_s24 = sadd.s32 1, %s1886_s19  ;;  %s28_s25 = sadd.s32 1, %s1890_s20 }
   0xa   : > { %p26_p0 = scmp.ge.s32.totalorder %s25_s24, 4  ;;  %s61_s26 = sadd.s32 1, %s1874_s16 }
   0xb   : > { %p68_p1 = scmp.ne.s32.totalorder %s1874_s16, %s1870_s15  ;;  %p69_p2 = scmp.eq.s32.totalorder %s1894_s21, 0 }
   0xc   : > { %s2820_s24 = smov (%p26_p0, %s25_s24), 0  ;;  %s2822_s25 = smov (!%p26_p0, %s28_s25), %s1890_s20 }
   0xd   : > { %s58_s27 = ssub.s32 %s1886_s19, %s2820_s24  ;;  %p1982_p3 = por %p69_p2, %p68_p1 }
   0xe   : > { %p30_p4 = scmp.ge.s32.totalorder %s2822_s25, 2  ;;  %p59_p5 = scmp.eq.s32.totalorder %s58_s27, 0 }
   0xf   : > { %s113_s29 = sadd.s32 1, %s1866_s14  ;;  %p123_p6 = scmp.ne.s32.totalorder %s1866_s14, %s1862_s13 }
  0x10   : > { %s2824_s25 = smov (%p30_p4, %s2822_s25), 0  ;;  %p124_p7 = scmp.eq.s32.totalorder %s1553_s22, 7 }
  0x11   : > { %2788 = sst [smem:[#allocation7_spill]] %s2824_s25  ;;  %s110_s4 = ssub.s32 %s1890_s20, %s2824_s25 }
  0x12   : > { %s1992_s30 = scalar_select %p59_p5, %s1874_s16, %s61_s26  }
  0x13   : > { %p111_p8 = scmp.eq.s32.totalorder %s110_s4, 0  ;;  %p129_p9 = scmp.ne.s32.totalorder %s1862_s13, %s1858_s12 }
  0x14   : > { %p1998_p10 = por %p124_p7, %p123_p6  ;;  %p130_p11 = scmp.eq.s32.totalorder %s1554_s23, 7 }
  0x15   : > { %s2003_s6 = scalar_select %p111_p8, %s1866_s14, %s113_s29  }
  0x16   : > { %p2005_p12 = por %p130_p11, %p129_p9  ;;  %p1556_p13 = scmp.ge.s32.totalorder %s1894_s21, 8 }
  0x18   : > { %146 = sbr.rel (%p1556_p13) target bundleno = 103 (0x67), region = 16 }
  0x1d   : > { %159 = sbr.rel (!%p1982_p3) target bundleno = 103 (0x67), region = 24  ;;  %s161_s8 = sand.u32 (%p1982_p3), 1, %s1874_s16  }
  0x1e   : > { %s1593_s9 = sshll.u32 (%p1982_p3), %s1886_s19, 4  ;;  %s1557_s10 = sshll.u32 (%p1982_p3), %s161_s8, 9 }
  0x1f   : > { %s2791_s1 = sld [smem:[#allocation8_spill]] (%p1982_p3)  ;;  %s2022_s26 = scalar_lea.vmem (%p1982_p3), [#allocation3], %s1557_s10 }
  0x25   : > { %s2017_s23 = scalar_lea.vmem %s2791_s1, %s1593_s9 }
  0x26   : > { %v179_v0 = vld [vmem:[%s2017_s23] sm:$0xff]  ;;  %v181_v1 = vld [vmem:[%s2017_s23 + $0x8] sm:$0xff] }
  0x27   : > { %v183_v2 = vld [vmem:[%s2017_s23 + $0x40] sm:$0xff]  ;;  %180 = vst [vmem:[%s2022_s26] sm:$0xff] %v179_v0  ;;  %v185_v3 = vld [vmem:[%s2017_s23 + $0x48] sm:$0xff] }
  0x28   : > { %182 = vst [vmem:[%s2022_s26 + $0x8] sm:$0xff] %v181_v1  ;;  %v187_v4 = vld [vmem:[%s2017_s23 + $0x80] sm:$0xff]  ;;  %v189_v5 = vld [vmem:[%s2017_s23 + $0x88] sm:$0xff] }
  0x29   : > { %184 = vst [vmem:[%s2022_s26 + $0x10] sm:$0xff] %v183_v2  ;;  %v191_v6 = vld [vmem:[%s2017_s23 + $0xc0] sm:$0xff]  ;;  %v193_v7 = vld [vmem:[%s2017_s23 + $0xc8] sm:$0xff] }
  0x2a   : > { %186 = vst [vmem:[%s2022_s26 + $0x18] sm:$0xff] %v185_v3  ;;  %v195_v8 = vld [vmem:[%s2017_s23 + $0x100] sm:$0xff]  ;;  %v197_v9 = vld [vmem:[%s2017_s23 + $0x108] sm:$0xff] }
  0x2b   : > { %188 = vst [vmem:[%s2022_s26 + $0x20] sm:$0xff] %v187_v4  ;;  %v199_v10 = vld [vmem:[%s2017_s23 + $0x140] sm:$0xff]  ;;  %v201_v11 = vld [vmem:[%s2017_s23 + $0x148] sm:$0xff] }
  0x2c   : > { %190 = vst [vmem:[%s2022_s26 + $0x28] sm:$0xff] %v189_v5  ;;  %v203_v12 = vld [vmem:[%s2017_s23 + $0x180] sm:$0xff]  ;;  %v205_v13 = vld [vmem:[%s2017_s23 + $0x188] sm:$0xff] }
  0x2d   : > { %192 = vst [vmem:[%s2022_s26 + $0x30] sm:$0xff] %v191_v6  ;;  %v207_v14 = vld [vmem:[%s2017_s23 + $0x1c0] sm:$0xff]  ;;  %v209_v15 = vld [vmem:[%s2017_s23 + $0x1c8] sm:$0xff] }
  0x2e   : > { %194 = vst [vmem:[%s2022_s26 + $0x38] sm:$0xff] %v193_v7  ;;  %v211_v16 = vld [vmem:[%s2017_s23 + $0x200] sm:$0xff]  ;;  %v213_v17 = vld [vmem:[%s2017_s23 + $0x208] sm:$0xff] }
  0x2f   : > { %196 = vst [vmem:[%s2022_s26 + $0x40] sm:$0xff] %v195_v8  ;;  %v215_v18 = vld [vmem:[%s2017_s23 + $0x240] sm:$0xff]  ;;  %v217_v19 = vld [vmem:[%s2017_s23 + $0x248] sm:$0xff] }
  0x30   : > { %198 = vst [vmem:[%s2022_s26 + $0x48] sm:$0xff] %v197_v9  ;;  %v219_v20 = vld [vmem:[%s2017_s23 + $0x280] sm:$0xff]  ;;  %v221_v21 = vld [vmem:[%s2017_s23 + $0x288] sm:$0xff] }
  0x31   : > { %200 = vst [vmem:[%s2022_s26 + $0x50] sm:$0xff] %v199_v10  ;;  %v223_v22 = vld [vmem:[%s2017_s23 + $0x2c0] sm:$0xff]  ;;  %v225_v23 = vld [vmem:[%s2017_s23 + $0x2c8] sm:$0xff] }
  0x32   : > { %202 = vst [vmem:[%s2022_s26 + $0x58] sm:$0xff] %v201_v11  ;;  %v227_v24 = vld [vmem:[%s2017_s23 + $0x300] sm:$0xff]  ;;  %v229_v25 = vld [vmem:[%s2017_s23 + $0x308] sm:$0xff] }
  0x33   : > { %204 = vst [vmem:[%s2022_s26 + $0x60] sm:$0xff] %v203_v12  ;;  %v231_v26 = vld [vmem:[%s2017_s23 + $0x340] sm:$0xff]  ;;  %v233_v27 = vld [vmem:[%s2017_s23 + $0x348] sm:$0xff] }
  0x34   : > { %206 = vst [vmem:[%s2022_s26 + $0x68] sm:$0xff] %v205_v13  ;;  %v235_v28 = vld [vmem:[%s2017_s23 + $0x380] sm:$0xff]  ;;  %v237_v29 = vld [vmem:[%s2017_s23 + $0x388] sm:$0xff] }
  0x35   : > { %208 = vst [vmem:[%s2022_s26 + $0x70] sm:$0xff] %v207_v14  ;;  %v239_v30 = vld [vmem:[%s2017_s23 + $0x3c0] sm:$0xff]  ;;  %v241_v31 = vld [vmem:[%s2017_s23 + $0x3c8] sm:$0xff] }
  0x36   : > { %210 = vst [vmem:[%s2022_s26 + $0x78] sm:$0xff] %v209_v15  ;;  %v243_v32 = vld [vmem:[%s2017_s23 + $0x400] sm:$0xff]  ;;  %v245_v33 = vld [vmem:[%s2017_s23 + $0x408] sm:$0xff] }
  0x37   : > { %212 = vst [vmem:[%s2022_s26 + $0x80] sm:$0xff] %v211_v16  ;;  %v247_v34 = vld [vmem:[%s2017_s23 + $0x440] sm:$0xff]  ;;  %v249_v35 = vld [vmem:[%s2017_s23 + $0x448] sm:$0xff] }
  0x38   : > { %214 = vst [vmem:[%s2022_s26 + $0x88] sm:$0xff] %v213_v17  ;;  %v251_v36 = vld [vmem:[%s2017_s23 + $0x480] sm:$0xff]  ;;  %v253_v37 = vld [vmem:[%s2017_s23 + $0x488] sm:$0xff] }
  0x39   : > { %216 = vst [vmem:[%s2022_s26 + $0x90] sm:$0xff] %v215_v18  ;;  %v255_v38 = vld [vmem:[%s2017_s23 + $0x4c0] sm:$0xff]  ;;  %v257_v39 = vld [vmem:[%s2017_s23 + $0x4c8] sm:$0xff] }
  0x3a   : > { %218 = vst [vmem:[%s2022_s26 + $0x98] sm:$0xff] %v217_v19  ;;  %v259_v40 = vld [vmem:[%s2017_s23 + $0x500] sm:$0xff]  ;;  %v261_v41 = vld [vmem:[%s2017_s23 + $0x508] sm:$0xff] }
  0x3b   : > { %220 = vst [vmem:[%s2022_s26 + $0xa0] sm:$0xff] %v219_v20  ;;  %v263_v42 = vld [vmem:[%s2017_s23 + $0x540] sm:$0xff]  ;;  %v265_v43 = vld [vmem:[%s2017_s23 + $0x548] sm:$0xff] }
  0x3c   : > { %222 = vst [vmem:[%s2022_s26 + $0xa8] sm:$0xff] %v221_v21  ;;  %v267_v44 = vld [vmem:[%s2017_s23 + $0x580] sm:$0xff]  ;;  %v269_v45 = vld [vmem:[%s2017_s23 + $0x588] sm:$0xff] }
  0x3d   : > { %224 = vst [vmem:[%s2022_s26 + $0xb0] sm:$0xff] %v223_v22  ;;  %v271_v46 = vld [vmem:[%s2017_s23 + $0x5c0] sm:$0xff]  ;;  %v273_v47 = vld [vmem:[%s2017_s23 + $0x5c8] sm:$0xff] }
  0x3e   : > { %226 = vst [vmem:[%s2022_s26 + $0xb8] sm:$0xff] %v225_v23  ;;  %v275_v48 = vld [vmem:[%s2017_s23 + $0x600] sm:$0xff]  ;;  %v277_v49 = vld [vmem:[%s2017_s23 + $0x608] sm:$0xff] }
  0x3f   : > { %228 = vst [vmem:[%s2022_s26 + $0xc0] sm:$0xff] %v227_v24  ;;  %v279_v50 = vld [vmem:[%s2017_s23 + $0x640] sm:$0xff]  ;;  %v281_v51 = vld [vmem:[%s2017_s23 + $0x648] sm:$0xff] }
  0x40   : > { %230 = vst [vmem:[%s2022_s26 + $0xc8] sm:$0xff] %v229_v25  ;;  %v283_v52 = vld [vmem:[%s2017_s23 + $0x680] sm:$0xff]  ;;  %v285_v53 = vld [vmem:[%s2017_s23 + $0x688] sm:$0xff] }
  0x41   : > { %232 = vst [vmem:[%s2022_s26 + $0xd0] sm:$0xff] %v231_v26  ;;  %v287_v54 = vld [vmem:[%s2017_s23 + $0x6c0] sm:$0xff]  ;;  %v289_v55 = vld [vmem:[%s2017_s23 + $0x6c8] sm:$0xff] }
  0x42   : > { %234 = vst [vmem:[%s2022_s26 + $0xd8] sm:$0xff] %v233_v27  ;;  %v291_v56 = vld [vmem:[%s2017_s23 + $0x700] sm:$0xff]  ;;  %v293_v57 = vld [vmem:[%s2017_s23 + $0x708] sm:$0xff] }
  0x43   : > { %236 = vst [vmem:[%s2022_s26 + $0xe0] sm:$0xff] %v235_v28  ;;  %v295_v58 = vld [vmem:[%s2017_s23 + $0x740] sm:$0xff]  ;;  %v297_v59 = vld [vmem:[%s2017_s23 + $0x748] sm:$0xff] }
  0x44   : > { %238 = vst [vmem:[%s2022_s26 + $0xe8] sm:$0xff] %v237_v29  ;;  %v299_v60 = vld [vmem:[%s2017_s23 + $0x780] sm:$0xff]  ;;  %v301_v61 = vld [vmem:[%s2017_s23 + $0x788] sm:$0xff] }
  0x45   : > { %240 = vst [vmem:[%s2022_s26 + $0xf0] sm:$0xff] %v239_v30  ;;  %v303_v62 = vld [vmem:[%s2017_s23 + $0x7c0] sm:$0xff]  ;;  %v305_v63 = vld [vmem:[%s2017_s23 + $0x7c8] sm:$0xff] }
  0x46   : > { %242 = vst [vmem:[%s2022_s26 + $0xf8] sm:$0xff] %v241_v31 }
  0x47   : > { %244 = vst [vmem:[%s2022_s26 + $0x100] sm:$0xff] %v243_v32 }
  0x48   : > { %246 = vst [vmem:[%s2022_s26 + $0x108] sm:$0xff] %v245_v33 }
  0x49   : > { %248 = vst [vmem:[%s2022_s26 + $0x110] sm:$0xff] %v247_v34 }
  0x4a   : > { %250 = vst [vmem:[%s2022_s26 + $0x118] sm:$0xff] %v249_v35 }
  0x4b   : > { %252 = vst [vmem:[%s2022_s26 + $0x120] sm:$0xff] %v251_v36 }
  0x4c   : > { %254 = vst [vmem:[%s2022_s26 + $0x128] sm:$0xff] %v253_v37 }
  0x4d   : > { %256 = vst [vmem:[%s2022_s26 + $0x130] sm:$0xff] %v255_v38 }
  0x4e   : > { %258 = vst [vmem:[%s2022_s26 + $0x138] sm:$0xff] %v257_v39 }
  0x4f   : > { %260 = vst [vmem:[%s2022_s26 + $0x140] sm:$0xff] %v259_v40 }
  0x50   : > { %262 = vst [vmem:[%s2022_s26 + $0x148] sm:$0xff] %v261_v41 }
  0x51   : > { %264 = vst [vmem:[%s2022_s26 + $0x150] sm:$0xff] %v263_v42 }
  0x52   : > { %266 = vst [vmem:[%s2022_s26 + $0x158] sm:$0xff] %v265_v43 }
  0x53   : > { %268 = vst [vmem:[%s2022_s26 + $0x160] sm:$0xff] %v267_v44 }
  0x54   : > { %270 = vst [vmem:[%s2022_s26 + $0x168] sm:$0xff] %v269_v45 }
  0x55   : > { %272 = vst [vmem:[%s2022_s26 + $0x170] sm:$0xff] %v271_v46 }
  0x56   : > { %274 = vst [vmem:[%s2022_s26 + $0x178] sm:$0xff] %v273_v47 }
  0x57   : > { %276 = vst [vmem:[%s2022_s26 + $0x180] sm:$0xff] %v275_v48 }
  0x58   : > { %278 = vst [vmem:[%s2022_s26 + $0x188] sm:$0xff] %v277_v49 }
  0x59   : > { %280 = vst [vmem:[%s2022_s26 + $0x190] sm:$0xff] %v279_v50 }
  0x5a   : > { %282 = vst [vmem:[%s2022_s26 + $0x198] sm:$0xff] %v281_v51 }
  0x5b   : > { %284 = vst [vmem:[%s2022_s26 + $0x1a0] sm:$0xff] %v283_v52 }
  0x5c   : > { %286 = vst [vmem:[%s2022_s26 + $0x1a8] sm:$0xff] %v285_v53 }
  0x5d   : > { %288 = vst [vmem:[%s2022_s26 + $0x1b0] sm:$0xff] %v287_v54 }
  0x5e   : > { %290 = vst [vmem:[%s2022_s26 + $0x1b8] sm:$0xff] %v289_v55 }
  0x5f   : > { %292 = vst [vmem:[%s2022_s26 + $0x1c0] sm:$0xff] %v291_v56 }
  0x60   : > { %294 = vst [vmem:[%s2022_s26 + $0x1c8] sm:$0xff] %v293_v57 }
  0x61   : > { %296 = vst [vmem:[%s2022_s26 + $0x1d0] sm:$0xff] %v295_v58 }
  0x62   : > { %298 = vst [vmem:[%s2022_s26 + $0x1d8] sm:$0xff] %v297_v59 }
  0x63   : > { %300 = vst [vmem:[%s2022_s26 + $0x1e0] sm:$0xff] %v299_v60 }
  0x64   : > { %302 = vst [vmem:[%s2022_s26 + $0x1e8] sm:$0xff] %v301_v61 }
  0x65   : > { %304 = vst [vmem:[%s2022_s26 + $0x1f0] sm:$0xff] %v303_v62 }
  0x66   : > { %306 = vst [vmem:[%s2022_s26 + $0x1f8] sm:$0xff] %v305_v63 }
  0x67 PF: > { %p1560_p0 = scmp.ge.s32.totalorder %s1894_s21, 1  ;;  %p321_p1 = scmp.lt.s32.totalorder %s1894_s21, 9 }
  0x69   : > { %p322_p2 = pnand %p1560_p0, %p321_p1 }
  0x6a   : > { %s328_s27 = sand.u32 (!%p322_p2), 1, %s1870_s15   ;;  %s2785_s28 = sand.u32 (!%p322_p2), 1, %s1862_s13  }
  0x6b   : > { %325 = sbr.rel (%p322_p2) target bundleno = 685 (0x2ad), region = 51  ;;  %s1561_s29 = sshll.u32 (!%p322_p2), %s328_s27, 9 }
  0x6c   : > { %s1562_s4 = sshll.u32 (!%p322_p2), %s2785_s28, 8  ;;  %s1563_s8 = sshll.u32 (!%p322_p2), %s1882_s18, 4 }
  0x6d   : > { %s1566_s9 = sshll.u32 (!%p322_p2), %s1878_s17, 4  ;;  %p364_p3 = scmp.lt.s32.totalorder (!%p322_p2), %s1563_s8, 31 }
  0x6e   : > { %p372_p4 = scmp.lt.s32.totalorder (!%p322_p2), %s1566_s9, 63  ;;  %s2167_s27 = scalar_lea.vmem (!%p322_p2), [#allocation3], %s1561_s29 }
  0x6f   : > { %s2169_s28 = scalar_lea.vmem (!%p322_p2), [#allocation4], %s1562_s4  ;;  %p1569_p5 = scmp.ne.s32.totalorder (!%p322_p2), %s1878_s17, 0 }
  0x70   : > { %s2826_s8 = smov (!%p364_p3, %s1563_s8), 31  ;;  %s2828_s9 = smov (!%p372_p4, %s1566_s9), 63 }
  0x71   : > { %s1594_s10 = sshll.u32 %s2826_s8, 4  ;;  %s1595_s26 = sshll.u32 %s2828_s9, 4 }
  0x72   : > { %s2160_s23 = scalar_lea.vmem %s2780_s0, %s1594_s10  ;;  %s2165_s15 = scalar_lea.vmem %s2782_s2, %s1595_s26 }
  0x73   : > { %382 = sbr.rel (%p1569_p5) target bundleno = 153 (0x99), region = 59 }
  0x78   : > { %v1896_v0 = vmov 0.0  }
  0x79   : > { %383 = vst [vmem:[#allocation2 + $0xb0] sm:$0xff] %v1896_v0 }
  0x7a   : > { %384 = vst [vmem:[#allocation2] sm:$0xff] %v1896_v0 }
  0x7b   : > { %385 = vst [vmem:[#allocation2 + $0xd8] sm:$0xff] %v1896_v0 }
  0x7c   : > { %386 = vst [vmem:[#allocation2 + $0x18] sm:$0xff] %v1896_v0 }
  0x7d   : > { %387 = vst [vmem:[#allocation2 + $0x50] sm:$0xff] %v1896_v0 }
  0x7e   : > { %388 = vst [vmem:[#allocation2 + $0x68] sm:$0xff] %v1896_v0 }
  0x7f   : > { %389 = vst [vmem:[#allocation2 + $0x30] sm:$0xff] %v1896_v0 }
  0x80   : > { %390 = vst [vmem:[#allocation2 + $0x48] sm:$0xff] %v1896_v0 }
  0x81   : > { %391 = vst [vmem:[#allocation2 + $0x80] sm:$0xff] %v1896_v0 }
  0x82   : > { %392 = vst [vmem:[#allocation2 + $0x88] sm:$0xff] %v1896_v0 }
  0x83   : > { %393 = vst [vmem:[#allocation2 + $0xe8] sm:$0xff] %v1896_v0 }
  0x84   : > { %394 = vst [vmem:[#allocation2 + $0xb8] sm:$0xff] %v1896_v0 }
  0x85   : > { %395 = vst [vmem:[#allocation2 + $0x60] sm:$0xff] %v1896_v0 }
  0x86   : > { %396 = vst [vmem:[#allocation2 + $0xf0] sm:$0xff] %v1896_v0 }
  0x87   : > { %397 = vst [vmem:[#allocation2 + $0x8] sm:$0xff] %v1896_v0 }
  0x88   : > { %398 = vst [vmem:[#allocation2 + $0x78] sm:$0xff] %v1896_v0 }
  0x89   : > { %399 = vst [vmem:[#allocation2 + $0x38] sm:$0xff] %v1896_v0 }
  0x8a   : > { %400 = vst [vmem:[#allocation2 + $0x58] sm:$0xff] %v1896_v0 }
  0x8b   : > { %401 = vst [vmem:[#allocation2 + $0x40] sm:$0xff] %v1896_v0 }
  0x8c   : > { %402 = vst [vmem:[#allocation2 + $0xc8] sm:$0xff] %v1896_v0 }
  0x8d   : > { %403 = vst [vmem:[#allocation2 + $0xe0] sm:$0xff] %v1896_v0 }
  0x8e   : > { %404 = vst [vmem:[#allocation2 + $0x90] sm:$0xff] %v1896_v0 }
  0x8f   : > { %405 = vst [vmem:[#allocation2 + $0x70] sm:$0xff] %v1896_v0 }
  0x90   : > { %406 = vst [vmem:[#allocation2 + $0xc0] sm:$0xff] %v1896_v0 }
  0x91   : > { %407 = vst [vmem:[#allocation2 + $0xa8] sm:$0xff] %v1896_v0 }
  0x92   : > { %408 = vst [vmem:[#allocation2 + $0xd0] sm:$0xff] %v1896_v0 }
  0x93   : > { %409 = vst [vmem:[#allocation2 + $0x10] sm:$0xff] %v1896_v0 }
  0x94   : > { %410 = vst [vmem:[#allocation2 + $0x28] sm:$0xff] %v1896_v0 }
  0x95   : > { %411 = vst [vmem:[#allocation2 + $0xa0] sm:$0xff] %v1896_v0 }
  0x96   : > { %412 = vst [vmem:[#allocation2 + $0xf8] sm:$0xff] %v1896_v0 }
  0x97   : > { %413 = vst [vmem:[#allocation2 + $0x20] sm:$0xff] %v1896_v0 }
  0x98   : > { %414 = vst [vmem:[#allocation2 + $0x98] sm:$0xff] %v1896_v0 }
  0x99 PF: > { %v477_v1 = vld [vmem:[%s2167_s27 + $0xf0] sm:$0xff]  ;;  %v475_v3 = vld [vmem:[%s2167_s27 + $0xe0] sm:$0xff]  ;;  %v2208_v34 = vld [vmem:[%s2160_s23 + $0x88] sm:$0xff]  ;;  %p1586_p6 = scmp.ne.s32.totalorder %s1878_s17, 3 }
  0x9a   : > { %v509_v2 = vld [vmem:[%s2167_s27 + $0x1f0] sm:$0xff]  ;;  %1598 = vmatpush.msra.mxu2 %v477_v1  ;;  %v507_v4 = vld [vmem:[%s2167_s27 + $0x1e0] sm:$0xff]  ;;  %511 = vmatpush.msra.mxu0 %v477_v1  ;;  %v478_v35 = vld [vmem:[%s2167_s27 + $0xf8] sm:$0xff] }
  0x9b   : > { %1614 = vmatpush.msra.mxu3 %v509_v2  ;;  %v473_v5 = vld [vmem:[%s2167_s27 + $0xd0] sm:$0xff]  ;;  %576 = vmatpush.msra.mxu1 %v509_v2  ;;  %v471_v7 = vld [vmem:[%s2167_s27 + $0xc0] sm:$0xff]  ;;  %v510_v36 = vld [vmem:[%s2167_s27 + $0x1f8] sm:$0xff] }
  0x9c   : > { %v505_v6 = vld [vmem:[%s2167_s27 + $0x1d0] sm:$0xff]  ;;  %1599 = vmatpush.msra.mxu2 %v475_v3  ;;  %v503_v8 = vld [vmem:[%s2167_s27 + $0x1c0] sm:$0xff]  ;;  %512 = vmatpush.msra.mxu0 %v475_v3  ;;  %v476_v37 = vld [vmem:[%s2167_s27 + $0xe8] sm:$0xff] }
  0x9d   : > { %1615 = vmatpush.msra.mxu3 %v507_v4  ;;  %577 = vmatpush.msra.mxu1 %v507_v4  ;;  %v469_v9 = vld [vmem:[%s2167_s27 + $0xb0] sm:$0xff]  ;;  %v467_v11 = vld [vmem:[%s2167_s27 + $0xa0] sm:$0xff]  ;;  %v508_v38 = vld [vmem:[%s2167_s27 + $0x1e8] sm:$0xff] }
  0x9e   : > { %1600 = vmatpush.msra.mxu2 %v473_v5  ;;  %v501_v10 = vld [vmem:[%s2167_s27 + $0x1b0] sm:$0xff]  ;;  %513 = vmatpush.msra.mxu0 %v473_v5  ;;  %v499_v12 = vld [vmem:[%s2167_s27 + $0x1a0] sm:$0xff]  ;;  %v2220_v40 = vld [vmem:[%s2160_s23 + $0x8] sm:$0xff] }
  0x9f   : > { %1616 = vmatpush.msra.mxu3 %v505_v6  ;;  %578 = vmatpush.msra.mxu1 %v505_v6  ;;  %v465_v13 = vld [vmem:[%s2167_s27 + $0x90] sm:$0xff]  ;;  %v463_v15 = vld [vmem:[%s2167_s27 + $0x80] sm:$0xff]  ;;  %v474_v41 = vld [vmem:[%s2167_s27 + $0xd8] sm:$0xff] }
  0xa0   : > { %1601 = vmatpush.msra.mxu2 %v471_v7  ;;  %514 = vmatpush.msra.mxu0 %v471_v7  ;;  %v497_v14 = vld [vmem:[%s2167_s27 + $0x190] sm:$0xff]  ;;  %v495_v16 = vld [vmem:[%s2167_s27 + $0x180] sm:$0xff]  ;;  %v506_v42 = vld [vmem:[%s2167_s27 + $0x1d8] sm:$0xff] }
  0xa1   : > { %1617 = vmatpush.msra.mxu3 %v503_v8  ;;  %579 = vmatpush.msra.mxu1 %v503_v8  ;;  %v461_v17 = vld [vmem:[%s2167_s27 + $0x70] sm:$0xff]  ;;  %v459_v19 = vld [vmem:[%s2167_s27 + $0x60] sm:$0xff]  ;;  %v472_v43 = vld [vmem:[%s2167_s27 + $0xc8] sm:$0xff] }
  0xa2   : > { %1602 = vmatpush.msra.mxu2 %v469_v9  ;;  %515 = vmatpush.msra.mxu0 %v469_v9  ;;  %v493_v18 = vld [vmem:[%s2167_s27 + $0x170] sm:$0xff]  ;;  %v491_v20 = vld [vmem:[%s2167_s27 + $0x160] sm:$0xff]  ;;  %v504_v44 = vld [vmem:[%s2167_s27 + $0x1c8] sm:$0xff] }
  0xa3   : > { %1618 = vmatpush.msra.mxu3 %v501_v10  ;;  %580 = vmatpush.msra.mxu1 %v501_v10  ;;  %v457_v21 = vld [vmem:[%s2167_s27 + $0x50] sm:$0xff]  ;;  %v455_v23 = vld [vmem:[%s2167_s27 + $0x40] sm:$0xff]  ;;  %v2232_v46 = vld [vmem:[%s2160_s23 + $0x98] sm:$0xff] }
  0xa4   : > { %1603 = vmatpush.msra.mxu2 %v467_v11  ;;  %516 = vmatpush.msra.mxu0 %v467_v11  ;;  %v489_v22 = vld [vmem:[%s2167_s27 + $0x150] sm:$0xff]  ;;  %v487_v24 = vld [vmem:[%s2167_s27 + $0x140] sm:$0xff]  ;;  %v470_v47 = vld [vmem:[%s2167_s27 + $0xb8] sm:$0xff] }
  0xa5   : > { %1619 = vmatpush.msra.mxu3 %v499_v12  ;;  %581 = vmatpush.msra.mxu1 %v499_v12  ;;  %v453_v25 = vld [vmem:[%s2167_s27 + $0x30] sm:$0xff]  ;;  %v451_v27 = vld [vmem:[%s2167_s27 + $0x20] sm:$0xff]  ;;  %v502_v48 = vld [vmem:[%s2167_s27 + $0x1b8] sm:$0xff] }
  0xa6   : > { %1604 = vmatpush.msra.mxu2 %v465_v13  ;;  %517 = vmatpush.msra.mxu0 %v465_v13  ;;  %v485_v26 = vld [vmem:[%s2167_s27 + $0x130] sm:$0xff]  ;;  %v483_v28 = vld [vmem:[%s2167_s27 + $0x120] sm:$0xff]  ;;  %v468_v49 = vld [vmem:[%s2167_s27 + $0xa8] sm:$0xff] }
  0xa7   : > { %1620 = vmatpush.msra.mxu3 %v497_v14  ;;  %582 = vmatpush.msra.mxu1 %v497_v14  ;;  %v449_v29 = vld [vmem:[%s2167_s27 + $0x10] sm:$0xff]  ;;  %v447_v31 = vld [vmem:[%s2167_s27] sm:$0xff]  ;;  %v500_v50 = vld [vmem:[%s2167_s27 + $0x1a8] sm:$0xff] }
  0xa8   : > { %1605 = vmatpush.msra.mxu2 %v463_v15  ;;  %518 = vmatpush.msra.mxu0 %v463_v15  ;;  %v481_v30 = vld [vmem:[%s2167_s27 + $0x110] sm:$0xff]  ;;  %v479_v32 = vld [vmem:[%s2167_s27 + $0x100] sm:$0xff]  ;;  %v2244_v52 = vld [vmem:[%s2160_s23 + $0x18] sm:$0xff] }
  0xa9   : > { %1621 = vmatpush.msra.mxu3 %v495_v16  ;;  %583 = vmatpush.msra.mxu1 %v495_v16  ;;  %v2205_v33 = vld [vmem:[%s2160_s23 + $0x80] sm:$0xff]  ;;  %v2229_v45 = vld [vmem:[%s2160_s23 + $0x90] sm:$0xff]  ;;  %v466_v53 = vld [vmem:[%s2167_s27 + $0x98] sm:$0xff] }
  0xaa   : > { %1606 = vmatpush.msra.mxu2 %v461_v17  ;;  %519 = vmatpush.msra.mxu0 %v461_v17  ;;  %v2217_v39 = vld [vmem:[%s2160_s23] sm:$0xff]  ;;  %v2241_v51 = vld [vmem:[%s2160_s23 + $0x10] sm:$0xff]  ;;  %v498_v54 = vld [vmem:[%s2167_s27 + $0x198] sm:$0xff] }
  0xab   : > { %1622 = vmatpush.msra.mxu3 %v493_v18  ;;  %584 = vmatpush.msra.mxu1 %v493_v18  ;;  %v464_v55 = vld [vmem:[%s2167_s27 + $0x88] sm:$0xff]  ;;  %v2253_v57 = vld [vmem:[%s2160_s23 + $0xa0] sm:$0xff]  ;;  %v462_v59 = vld [vmem:[%s2167_s27 + $0x78] sm:$0xff] }
  0xac   : > { %1607 = vmatpush.msra.mxu2 %v459_v19  ;;  %520 = vmatpush.msra.mxu0 %v459_v19  ;;  %v496_v56 = vld [vmem:[%s2167_s27 + $0x188] sm:$0xff]  ;;  %v494_v60 = vld [vmem:[%s2167_s27 + $0x178] sm:$0xff]  ;;  %v2265_v63 = vld [vmem:[%s2160_s23 + $0x20] sm:$0xff] }
  0xad   : > { %1623 = vmatpush.msra.mxu3 %v491_v20  ;;  %585 = vmatpush.msra.mxu1 %v491_v20  ;;  %v2256_v58 = vld [vmem:[%s2160_s23 + $0xa8] sm:$0xff]  ;;  %v458_v1 = vld [vmem:[%s2167_s27 + $0x58] sm:$0xff]  ;;  %v2277_v5 = vld [vmem:[%s2160_s23 + $0xb0] sm:$0xff] }
  0xae   : > { %1608 = vmatpush.msra.mxu2 %v457_v21  ;;  %521 = vmatpush.msra.mxu0 %v457_v21  ;;  %v460_v61 = vld [vmem:[%s2167_s27 + $0x68] sm:$0xff]  ;;  %v490_v2 = vld [vmem:[%s2167_s27 + $0x158] sm:$0xff]  ;;  %v421_v11 = vld [vmem:[%s2160_s23 + $0x30] sm:$0xff] }
  0xaf   : > { %1624 = vmatpush.msra.mxu3 %v489_v22  ;;  %586 = vmatpush.msra.mxu1 %v489_v22  ;;  %v492_v62 = vld [vmem:[%s2167_s27 + $0x168] sm:$0xff]  ;;  %v2280_v6 = vld [vmem:[%s2160_s23 + $0xb8] sm:$0xff]  ;;  %v2295_v17 = vld [vmem:[%s2160_s23 + $0xc0] sm:$0xff] }
  0xb0   : > { %1609 = vmatpush.msra.mxu2 %v455_v23  ;;  %522 = vmatpush.msra.mxu0 %v455_v23  ;;  %v2268_v0 = vld [vmem:[%s2160_s23 + $0x28] sm:$0xff]  ;;  %v454_v7 = vld [vmem:[%s2167_s27 + $0x38] sm:$0xff]  ;;  %v423_v19 = vld [vmem:[%s2160_s23 + $0x40] sm:$0xff] }
  0xb1   : > { %1625 = vmatpush.msra.mxu3 %v487_v24  ;;  %587 = vmatpush.msra.mxu1 %v487_v24  ;;  %v456_v3 = vld [vmem:[%s2167_s27 + $0x48] sm:$0xff]  ;;  %v486_v8 = vld [vmem:[%s2167_s27 + $0x138] sm:$0xff]  ;;  %v2305_v21 = vld [vmem:[%s2160_s23 + $0xd0] sm:$0xff] }
  0xb2   : > { %1610 = vmatpush.msra.mxu2 %v453_v25  ;;  %523 = vmatpush.msra.mxu0 %v453_v25  ;;  %v488_v4 = vld [vmem:[%s2167_s27 + $0x148] sm:$0xff]  ;;  %v422_v12 = vld [vmem:[%s2160_s23 + $0x38] sm:$0xff]  ;;  %v425_v23 = vld [vmem:[%s2160_s23 + $0x50] sm:$0xff] }
  0xb3   : > { %1626 = vmatpush.msra.mxu3 %v485_v26  ;;  %588 = vmatpush.msra.mxu1 %v485_v26  ;;  %v452_v9 = vld [vmem:[%s2167_s27 + $0x28] sm:$0xff]  ;;  %v450_v13 = vld [vmem:[%s2167_s27 + $0x18] sm:$0xff]  ;;  %v2315_v25 = vld [vmem:[%s2160_s23 + $0xe0] sm:$0xff] }
  0xb4   : > { %1611 = vmatpush.msra.mxu2 %v451_v27  ;;  %524 = vmatpush.msra.mxu0 %v451_v27  ;;  %v484_v10 = vld [vmem:[%s2167_s27 + $0x128] sm:$0xff]  ;;  %v482_v14 = vld [vmem:[%s2167_s27 + $0x118] sm:$0xff]  ;;  %v427_v27 = vld [vmem:[%s2160_s23 + $0x60] sm:$0xff] }
  0xb5   : > { %1627 = vmatpush.msra.mxu3 %v483_v28  ;;  %589 = vmatpush.msra.mxu1 %v483_v28  ;;  %v448_v15 = vld [vmem:[%s2167_s27 + $0x8] sm:$0xff]  ;;  %v2308_v22 = vld [vmem:[%s2160_s23 + $0xd8] sm:$0xff] }
  0xb6   : > { %1612 = vmatpush.msra.mxu2 %v449_v29  ;;  %525 = vmatpush.msra.mxu0 %v449_v29  ;;  %v480_v16 = vld [vmem:[%s2167_s27 + $0x108] sm:$0xff]  ;;  %v426_v24 = vld [vmem:[%s2160_s23 + $0x58] sm:$0xff]  ;;  %v2325_v29 = vld [vmem:[%s2160_s23 + $0xf0] sm:$0xff] }
  0xb7   : > { %1628 = vmatpush.msra.mxu3 %v481_v30  ;;  %590 = vmatpush.msra.mxu1 %v481_v30  ;;  %v2298_v18 = vld [vmem:[%s2160_s23 + $0xc8] sm:$0xff]  ;;  %v2328_v30 = vld [vmem:[%s2160_s23 + $0xf8] sm:$0xff] }
  0xb8   : > { %1613 = vmatpush.msra.mxu2 %v447_v31  ;;  %526 = vmatpush.msra.mxu0 %v447_v31  ;;  %v424_v20 = vld [vmem:[%s2160_s23 + $0x48] sm:$0xff]  ;;  %v429_v31 = vld [vmem:[%s2160_s23 + $0x70] sm:$0xff] }
  0xb9   : > { %1629 = vmatpush.msra.mxu3 %v479_v32  ;;  %551 = vmatmul.f32.vlgmr.msra.gmra.mxu2 %v2205_v33  ;;  %v2318_v26 = vld [vmem:[%s2160_s23 + $0xe8] sm:$0xff] }
  0xba   : > { %616 = vmatmul.f32.vlgmr.msra.gmra.mxu3 %v2208_v34  ;;  %641 = vmatpush.msrb.mxu2 %v478_v35  ;;  %v428_v28 = vld [vmem:[%s2160_s23 + $0x68] sm:$0xff]  ;;  %v1169_v35 = vld [vmem:[%s2165_s15 + $0xf0] sm:$0xff] }
  0xbb   : > { %706 = vmatpush.msrb.mxu3 %v510_v36  ;;  %591 = vmatpush.msra.mxu1 %v479_v32  ;;  %v430_v32 = vld [vmem:[%s2160_s23 + $0x78] sm:$0xff] }
  0xbc   : > { %642 = vmatpush.msrb.mxu2 %v476_v37  ;;  %527 = vmatmul.f32.vlgmr.msra.gmra.mxu0 %v2217_v39  ;;  %v1170_v36 = vld [vmem:[%s2165_s15 + $0xf8] sm:$0xff] }
  0xbd   : > { %707 = vmatpush.msrb.mxu3 %v508_v38  ;;  %592 = vmatmul.f32.vlgmr.msra.gmra.mxu1 %v2220_v40 }
  0xbe   : > { %643 = vmatpush.msrb.mxu2 %v474_v41  ;;  %1171 = vmatpush.msrb.mxu0 %v1169_v35  ;;  %v1144_v35 = vld [vmem:[%s2165_s15 + $0x28] sm:$0xff] }
  0xbf   : > { %708 = vmatpush.msrb.mxu3 %v506_v42  ;;  %1236 = vmatpush.msrb.mxu1 %v1170_v36  ;;  %v1167_v42 = vld [vmem:[%s2165_s15 + $0xe0] sm:$0xff] }
  0xc0   : > { %644 = vmatpush.msrb.mxu2 %v472_v43  ;;  %1172 = vmatpush.msrb.mxu0 %v1167_v42 }
  0xc1   : > { %709 = vmatpush.msrb.mxu3 %v504_v44  ;;  %554 = vmatmul.f32.gmra.mxu2 %v2229_v45 }
  0xc2   : > { %619 = vmatmul.f32.gmra.mxu3 %v2232_v46  ;;  %645 = vmatpush.msrb.mxu2 %v470_v47  ;;  %v1166_v47 = vld [vmem:[%s2165_s15 + $0xd8] sm:$0xff] }
  0xc3   : > { %710 = vmatpush.msrb.mxu3 %v502_v48 }
  0xc4   : > { %646 = vmatpush.msrb.mxu2 %v468_v49  ;;  %530 = vmatmul.f32.gmra.mxu0 %v2241_v51 }
  0xc5   : > { %711 = vmatpush.msrb.mxu3 %v500_v50  ;;  %595 = vmatmul.f32.gmra.mxu1 %v2244_v52  ;;  %v1164_v50 = vld [vmem:[%s2165_s15 + $0xc8] sm:$0xff] }
  0xc6   : > { %647 = vmatpush.msrb.mxu2 %v466_v53 }
  0xc7   : > { %712 = vmatpush.msrb.mxu3 %v498_v54  ;;  %v1161_v54 = vld [vmem:[%s2165_s15 + $0xb0] sm:$0xff] }
  0xc8   : > { %648 = vmatpush.msrb.mxu2 %v464_v55  ;;  %v1162_v55 = vld [vmem:[%s2165_s15 + $0xb8] sm:$0xff] }
  0xc9   : > { %713 = vmatpush.msrb.mxu3 %v496_v56  ;;  %557 = vmatmul.f32.gmra.mxu2 %v2253_v57 }
  0xca   : > { %622 = vmatmul.f32.gmra.mxu3 %v2256_v58  ;;  %649 = vmatpush.msrb.mxu2 %v462_v59  ;;  %v1159_v59 = vld [vmem:[%s2165_s15 + $0xa0] sm:$0xff] }
  0xcb   : > { %714 = vmatpush.msrb.mxu3 %v494_v60  ;;  %v1160_v60 = vld [vmem:[%s2165_s15 + $0xa8] sm:$0xff] }
  0xcc   : > { %650 = vmatpush.msrb.mxu2 %v460_v61  ;;  %533 = vmatmul.f32.gmra.mxu0 %v2265_v63  ;;  %v1157_v61 = vld [vmem:[%s2165_s15 + $0x90] sm:$0xff] }
  0xcd   : > { %715 = vmatpush.msrb.mxu3 %v492_v62  ;;  %598 = vmatmul.f32.gmra.mxu1 %v2268_v0  ;;  %v1158_v62 = vld [vmem:[%s2165_s15 + $0x98] sm:$0xff] }
  0xce   : > { %651 = vmatpush.msrb.mxu2 %v458_v1 }
  0xcf   : > { %716 = vmatpush.msrb.mxu3 %v490_v2 }
  0xd0   : > { %652 = vmatpush.msrb.mxu2 %v456_v3  ;;  %v1155_v3 = vld [vmem:[%s2165_s15 + $0x80] sm:$0xff] }
  0xd1   : > { %717 = vmatpush.msrb.mxu3 %v488_v4  ;;  %560 = vmatmul.f32.gmra.mxu2 %v2277_v5  ;;  %v1156_v4 = vld [vmem:[%s2165_s15 + $0x88] sm:$0xff] }
  0xd2   : > { %625 = vmatmul.f32.gmra.mxu3 %v2280_v6  ;;  %653 = vmatpush.msrb.mxu2 %v454_v7  ;;  %v1154_v7 = vld [vmem:[%s2165_s15 + $0x78] sm:$0xff] }
  0xd3   : > { %718 = vmatpush.msrb.mxu3 %v486_v8  ;;  %v1151_v8 = vld [vmem:[%s2165_s15 + $0x60] sm:$0xff] }
  0xd4   : > { %654 = vmatpush.msrb.mxu2 %v452_v9  ;;  %536 = vmatmul.f32.gmra.mxu0 %v421_v11  ;;  %v1152_v9 = vld [vmem:[%s2165_s15 + $0x68] sm:$0xff] }
  0xd5   : > { %719 = vmatpush.msrb.mxu3 %v484_v10  ;;  %601 = vmatmul.f32.gmra.mxu1 %v422_v12 }
  0xd6   : > { %655 = vmatpush.msrb.mxu2 %v450_v13 }
  0xd7   : > { %720 = vmatpush.msrb.mxu3 %v482_v14 }
  0xd8   : > { %656 = vmatpush.msrb.mxu2 %v448_v15  ;;  %v1149_v15 = vld [vmem:[%s2165_s15 + $0x50] sm:$0xff] }
  0xd9   : > { %721 = vmatpush.msrb.mxu3 %v480_v16  ;;  %563 = vmatmul.f32.gmra.mxu2 %v2295_v17  ;;  %v1150_v16 = vld [vmem:[%s2165_s15 + $0x58] sm:$0xff] }
  0xda   : > { %628 = vmatmul.f32.gmra.mxu3 %v2298_v18 }
  0xdc   : > { %539 = vmatmul.f32.gmra.mxu0 %v423_v19 }
  0xdd   : > { %604 = vmatmul.f32.gmra.mxu1 %v424_v20 }
  0xe1   : > { %566 = vmatmul.f32.gmra.mxu2 %v2305_v21 }
  0xe2   : > { %631 = vmatmul.f32.gmra.mxu3 %v2308_v22 }
  0xe4   : > { %542 = vmatmul.f32.gmra.mxu0 %v425_v23 }
  0xe5   : > { %607 = vmatmul.f32.gmra.mxu1 %v426_v24 }
  0xe9   : > { %569 = vmatmul.f32.gmra.mxu2 %v2315_v25 }
  0xea   : > { %634 = vmatmul.f32.gmra.mxu3 %v2318_v26 }
  0xec   : > { %545 = vmatmul.f32.gmra.mxu0 %v427_v27 }
  0xed   : > { %610 = vmatmul.f32.gmra.mxu1 %v428_v28 }
  0xf1   : > { %572 = vmatmul.f32.gmra.mxu2 %v2325_v29 }
  0xf2   : > { %637 = vmatmul.f32.gmra.mxu3 %v2328_v30 }
  0xf4   : > { %548 = vmatmul.f32.gmra.mxu0 %v429_v31 }
  0xf5   : > { %613 = vmatmul.f32.gmra.mxu1 %v430_v32 }
  0xf9   : > { %657 = vmatmul.f32.vlgmr.msrb.gmra.mxu2 %v2217_v39 }
  0xfa   : > { %722 = vmatmul.f32.vlgmr.msrb.gmra.mxu3 %v2220_v40 }
 0x101   : > { %660 = vmatmul.f32.gmra.mxu2 %v2241_v51 }
 0x102   : > { %725 = vmatmul.f32.gmra.mxu3 %v2244_v52 }
 0x109   : > { %663 = vmatmul.f32.gmra.mxu2 %v2265_v63 }
 0x10a   : > { %728 = vmatmul.f32.gmra.mxu3 %v2268_v0 }
 0x111   : > { %666 = vmatmul.f32.gmra.mxu2 %v421_v11 }
 0x112   : > { %731 = vmatmul.f32.gmra.mxu3 %v422_v12 }
 0x119   : > { %669 = vmatmul.f32.gmra.mxu2 %v423_v19 }
 0x11a   : > { %734 = vmatmul.f32.gmra.mxu3 %v424_v20  ;;  %v1147_v20 = vld [vmem:[%s2165_s15 + $0x40] sm:$0xff] }
 0x121   : > { %672 = vmatmul.f32.gmra.mxu2 %v425_v23  ;;  %v1148_v23 = vld [vmem:[%s2165_s15 + $0x48] sm:$0xff] }
 0x122   : > { %737 = vmatmul.f32.gmra.mxu3 %v426_v24  ;;  %v1145_v24 = vld [vmem:[%s2165_s15 + $0x30] sm:$0xff] }
 0x129   : > { %675 = vmatmul.f32.gmra.mxu2 %v427_v27 }
 0x12a   : > { %740 = vmatmul.f32.gmra.mxu3 %v428_v28  ;;  %v1146_v28 = vld [vmem:[%s2165_s15 + $0x38] sm:$0xff] }
 0x131   : > { %678 = vmatmul.f32.gmra.mxu2 %v429_v31 }
 0x132   : > { %743 = vmatmul.f32.gmra.mxu3 %v430_v32  ;;  %v1143_v32 = vld [vmem:[%s2165_s15 + $0x20] sm:$0xff] }
 0x139   : > { %681 = vmatmul.f32.gmra.mxu2 %v2205_v33  ;;  %v528_v40 = vpop.f32.mrf.mxu0  ;;  %v1168_v33 = vld [vmem:[%s2165_s15 + $0xe8] sm:$0xff] }
 0x13a   : > { %746 = vmatmul.f32.gmra.mxu3 %v2208_v34  ;;  %v593_v41 = vpop.f32.mrf.mxu1  ;;  %v1165_v34 = vld [vmem:[%s2165_s15 + $0xd0] sm:$0xff]  ;;  %1237 = vmatpush.msrb.mxu1 %v1168_v33 }
 0x13b   : > { %1173 = vmatpush.msrb.mxu0 %v1165_v34  ;;  %v2362_v56 = vadd.f32 %v593_v41, %v528_v40  ;;  %v1142_v40 = vld [vmem:[%s2165_s15 + $0x18] sm:$0xff]  ;;  %v1139_v34 = vld [vmem:[%s2165_s15] sm:$0xff] }
 0x13c   : > { %v552_v37 = vpop.f32.mrf.mxu2  ;;  %1238 = vmatpush.msrb.mxu1 %v1166_v47 }
 0x13d   : > { %v617_v38 = vpop.f32.mrf.mxu3  ;;  %v1570_v63 = vmul.f32 -1.442695, %v2362_v56 }
 0x13e   : > { %v2344_v39 = vadd.f32 %v617_v38, %v552_v37  ;;  %1239 = vmatpush.msrb.mxu1 %v1164_v50  ;;  %v1141_v38 = vld [vmem:[%s2165_s15 + $0x10] sm:$0xff] }
 0x13f   : > { %1720 = vpow2.f32 %v1570_v63 }
 0x140   : > { %1240 = vmatpush.msrb.mxu1 %v1162_v55 }
 0x141   : > { %684 = vmatmul.f32.gmra.mxu2 %v2229_v45  ;;  %v531_v49 = vpop.f32.mrf.mxu0 }
 0x142   : > { %749 = vmatmul.f32.gmra.mxu3 %v2232_v46  ;;  %v596_v45 = vpop.f32.mrf.mxu1  ;;  %v1163_v46 = vld [vmem:[%s2165_s15 + $0xc0] sm:$0xff]  ;;  %1241 = vmatpush.msrb.mxu1 %v1160_v60 }
 0x143   : > { %1174 = vmatpush.msrb.mxu0 %v1163_v46 }
 0x144   : > { %v555_v43 = vpop.f32.mrf.mxu2  ;;  %1242 = vmatpush.msrb.mxu1 %v1158_v62 }
 0x145   : > { %v620_v44 = vpop.f32.mrf.mxu3  ;;  %1175 = vmatpush.msrb.mxu0 %v1161_v54 }
 0x146   : > { %v2352_v48 = vadd.f32 %v620_v44, %v555_v43  ;;  %1243 = vmatpush.msrb.mxu1 %v1156_v4  ;;  %v1140_v43 = vld [vmem:[%s2165_s15 + $0x8] sm:$0xff] }
 0x147   : > { %1176 = vmatpush.msrb.mxu0 %v1159_v59 }
 0x148   : > { %1244 = vmatpush.msrb.mxu1 %v1154_v7 }
 0x149   : > { %687 = vmatmul.f32.gmra.mxu2 %v2253_v57  ;;  %v534_v57 = vpop.f32.mrf.mxu0  ;;  %1177 = vmatpush.msrb.mxu0 %v1157_v61 }
 0x14a   : > { %752 = vmatmul.f32.gmra.mxu3 %v2256_v58  ;;  %v599_v58 = vpop.f32.mrf.mxu1  ;;  %1245 = vmatpush.msrb.mxu1 %v1152_v9 }
 0x14b   : > { %1178 = vmatpush.msrb.mxu0 %v1155_v3 }
 0x14c   : > { %v558_v51 = vpop.f32.mrf.mxu2  ;;  %1246 = vmatpush.msrb.mxu1 %v1150_v16 }
 0x14d   : > { %v623_v52 = vpop.f32.mrf.mxu3 }
 0x14e   : > { %v2358_v53 = vadd.f32 %v623_v52, %v558_v51  ;;  %1247 = vmatpush.msrb.mxu1 %v1148_v23 }
 0x150   : > { %1248 = vmatpush.msrb.mxu1 %v1146_v28 }
 0x151   : > { %690 = vmatmul.f32.gmra.mxu2 %v2277_v5  ;;  %v2375_v5 = vadd.f32 %v596_v45, %v531_v49  ;;  %v537_v11 = vpop.f32.mrf.mxu0 }
 0x152   : > { %755 = vmatmul.f32.gmra.mxu3 %v2280_v6  ;;  %v1153_v6 = vld [vmem:[%s2165_s15 + $0x70] sm:$0xff]  ;;  %v602_v12 = vpop.f32.mrf.mxu1  ;;  %1249 = vmatpush.msrb.mxu1 %v1144_v35 }
 0x153   : > { %1179 = vmatpush.msrb.mxu0 %v1153_v6  ;;  %v1571_v10 = vmul.f32 -1.442695, %v2375_v5  ;;  %v2404_v42 = vadd.f32 %v602_v12, %v537_v11 }
 0x154   : > { %v561_v0 = vpop.f32.mrf.mxu2  ;;  %1250 = vmatpush.msrb.mxu1 %v1142_v40 }
 0x155   : > { %v626_v1 = vpop.f32.mrf.mxu3  ;;  %1180 = vmatpush.msrb.mxu0 %v1151_v8  ;;  %1722 = vpow2.f32 %v1571_v10  ;;  %v1573_v47 = vmul.f32 -1.442695, %v2404_v42 }
 0x156   : > { %v2371_v2 = vadd.f32 %v626_v1, %v561_v0  ;;  %1251 = vmatpush.msrb.mxu1 %v1140_v43 }
 0x157   : > { %1181 = vmatpush.msrb.mxu0 %v1149_v15 }
 0x159   : > { %693 = vmatmul.f32.gmra.mxu2 %v2295_v17  ;;  %v1721_v17 = vpop.eup %1720  ;;  %1182 = vmatpush.msrb.mxu0 %v1147_v20 }
 0x15a   : > { %758 = vmatmul.f32.gmra.mxu3 %v2298_v18  ;;  %v2386_v18 = vadd.f32 %v599_v58, %v534_v57  ;;  %v2393_v27 = vadd.f32 1.0, %v1721_v17 }
 0x15b   : > { %1183 = vmatpush.msrb.mxu0 %v1145_v24  ;;  %v1723_v41 = vpop.eup %1722 }
 0x15c   : > { %v564_v13 = vpop.f32.mrf.mxu2  ;;  %v1572_v31 = vmul.f32 -1.442695, %v2386_v18  ;;  %1724 = vrcp.f32 %v2393_v27  ;;  %v2410_v44 = vadd.f32 1.0, %v1723_v41  ;;  %vm840_vm0 = vweird.f32 %v2393_v27 }
 0x15d   : > { %v629_v14 = vpop.f32.mrf.mxu3  ;;  %1184 = vmatpush.msrb.mxu0 %v1143_v32  ;;  %v846_v4 = vand.u32 2147483648, %v2393_v27  ;;  %v844_v10 = vand.u32 2147483647, %v2393_v27 }
 0x15e   : > { %v2388_v19 = vadd.f32 %v629_v14, %v564_v13  ;;  %1726 = vpow2.f32 %v1572_v31  ;;  %vm855_vm4 = vweird.f32 %v2410_v44  ;;  %v861_v28 = vand.u32 2147483648, %v2410_v44 }
 0x15f   : > { %1185 = vmatpush.msrb.mxu0 %v1141_v38  ;;  %1728 = vrcp.f32 %v2410_v44  ;;  %v847_v17 = vor.u32 1.1754944e-38, %v846_v4  ;;  %vm845_vm3 = vcmp.eq.f32.partialorder %v844_v10, 8.507059e+37 }
 0x160   : > { %1730 = vpow2.f32 %v1573_v47  ;;  %v862_v47 = vor.u32 1.1754944e-38, %v861_v28 }
 0x161   : > { %696 = vmatmul.f32.gmra.mxu2 %v2305_v21  ;;  %v540_v21 = vpop.f32.mrf.mxu0  ;;  %1186 = vmatpush.msrb.mxu0 %v1139_v34 }
 0x162   : > { %761 = vmatmul.f32.gmra.mxu3 %v2308_v22  ;;  %v605_v22 = vpop.f32.mrf.mxu1  ;;  %v1725_v49 = vpop.eup %1724 }
 0x163   : > { %v836_v51 = vmul.f32 %v1725_v49, %v2393_v27  ;;  %v2417_v52 = vadd.f32 %v605_v22, %v540_v21  ;;  %vm841_vm1 = vweird.f32 %v1725_v49 }
 0x164   : > { %v567_v36 = vpop.f32.mrf.mxu2  ;;  %v1727_v45 = vpop.eup %1726  ;;  %vm2443_vm2 = vmor %vm840_vm0, %vm841_vm1 }
 0x165   : > { %v632_v37 = vpop.f32.mrf.mxu3  ;;  %v2419_v54 = vadd.f32 1.0, %v1727_v45  ;;  %v837_v58 = vsub.f32 1.0, %v836_v51  ;;  %v1574_v59 = vmul.f32 -1.442695, %v2417_v52 }
 0x166   : > { %v2406_v33 = vadd.f32 %v632_v37, %v567_v36  ;;  %v859_v37 = vand.u32 2147483647, %v2410_v44 }
 0x167   : > { %1732 = vrcp.f32 %v2419_v54  ;;  %v838_v1 = vmul.f32 %v1725_v49, %v837_v58  ;;  %vm870_vm8 = vweird.f32 %v2419_v54 }
 0x168   : > { %1734 = vpow2.f32 %v1574_v59  ;;  %vm860_vm7 = vcmp.eq.f32.partialorder %v859_v37, 8.507059e+37 }
 0x169   : > { %699 = vmatmul.f32.gmra.mxu2 %v2315_v25  ;;  %v543_v55 = vpop.f32.mrf.mxu0  ;;  %v839_v9 = vadd.f32 %v1725_v49, %v838_v1 }
 0x16a   : > { %764 = vmatmul.f32.gmra.mxu3 %v2318_v26  ;;  %v608_v57 = vpop.f32.mrf.mxu1  ;;  %v2425_v26 = vpop.eup %1728 }
 0x16b   : > { %v1731_v60 = vpop.eup %1730  ;;  %v851_v63 = vmul.f32 %v2425_v26, %v2410_v44  ;;  %v843_v23 = vsel %vm2443_vm2, %v1725_v49, %v839_v9  ;;  %vm856_vm5 = vweird.f32 %v2425_v26 }
 0x16c   : > { %v570_v46 = vpop.f32.mrf.mxu2  ;;  %v848_v35 = vsel %vm845_vm3, %v847_v17, %v843_v23  ;;  %vm2464_vm6 = vmor %vm855_vm4, %vm856_vm5  ;;  %v1578_v23 = vmul.f32 -1.442695, %v2344_v39 }
 0x16d   : > { %v635_v50 = vpop.f32.mrf.mxu3  ;;  %v2438_v3 = vpop.eup %1732  ;;  %v852_v6 = vsub.f32 1.0, %v851_v63  ;;  %v1075_v43 = vmul.f32 %v848_v35, %v2362_v56 }
 0x16e   : > { %v2421_v25 = vadd.f32 %v635_v50, %v570_v46  ;;  %v1735_v13 = vpop.eup %1734  ;;  %v866_v14 = vmul.f32 %v2438_v3, %v2419_v54  ;;  %vm871_vm9 = vweird.f32 %v2438_v3 }
 0x16f   : > { %v853_v20 = vmul.f32 %v2425_v26, %v852_v6  ;;  %v2457_v27 = vadd.f32 1.0, %v1735_v13  ;;  %vm2488_vm10 = vmor %vm870_vm8, %vm871_vm9 }
 0x170   : > { %v867_v31 = vsub.f32 1.0, %v866_v14 }
 0x171   : > { %702 = vmatmul.f32.gmra.mxu2 %v2325_v29  ;;  %v2433_v29 = vadd.f32 %v608_v57, %v543_v55  ;;  %v546_v7 = vpop.f32.mrf.mxu0  ;;  %v854_v36 = vadd.f32 %v2425_v26, %v853_v20  ;;  %v876_v55 = vand.u32 2147483648, %v2419_v54  ;;  %vm900_vm0 = vweird.f32 %v2457_v27 }
 0x172   : > { %767 = vmatmul.f32.gmra.mxu3 %v2328_v30  ;;  %v2435_v30 = vadd.f32 1.0, %v1731_v60  ;;  %v611_v8 = vpop.f32.mrf.mxu1  ;;  %v868_v49 = vmul.f32 %v2438_v3, %v867_v31  ;;  %v874_v60 = vand.u32 2147483647, %v2419_v54 }
 0x173   : > { %v1575_v11 = vmul.f32 -1.442695, %v2433_v29  ;;  %v2453_v24 = vadd.f32 %v611_v8, %v546_v7  ;;  %v858_v50 = vsel %vm2464_vm6, %v2425_v26, %v854_v36  ;;  %v877_v6 = vor.u32 1.1754944e-38, %v876_v55 }
 0x174   : > { %v573_v61 = vpop.f32.mrf.mxu2  ;;  %1736 = vrcp.f32 %v2435_v30  ;;  %v863_v58 = vsel %vm860_vm7, %v862_v47, %v858_v50  ;;  %v869_v59 = vadd.f32 %v2438_v3, %v868_v49  ;;  %vm875_vm11 = vcmp.eq.f32.partialorder %v874_v60, 8.507059e+37 }
 0x175   : > { %v638_v62 = vpop.f32.mrf.mxu3  ;;  %1738 = vpow2.f32 %v1575_v11  ;;  %v1576_v40 = vmul.f32 -1.442695, %v2453_v24  ;;  %v1076_v4 = vmul.f32 %v863_v58, %v2375_v5  ;;  %vm885_vm12 = vweird.f32 %v2435_v30 }
 0x176   : > { %v2431_v0 = vadd.f32 %v638_v62, %v573_v61  ;;  %1740 = vrcp.f32 %v2457_v27  ;;  %v873_v54 = vsel %vm2488_vm10, %v2438_v3, %v869_v59  ;;  %v889_v13 = vand.u32 2147483647, %v2435_v30 }
 0x177   : > { %1742 = vpow2.f32 %v1576_v40  ;;  %v878_v5 = vsel %vm875_vm11, %v877_v6, %v873_v54  ;;  %v891_v14 = vand.u32 2147483648, %v2435_v30 }
 0x178   : > { %v1077_v31 = vmul.f32 %v878_v5, %v2386_v18  ;;  %vm890_vm15 = vcmp.eq.f32.partialorder %v889_v13, 8.507059e+37 }
 0x179   : > { %v549_v21 = vpop.f32.mrf.mxu0 }
 0x17a   : > { %v2460_v32 = vpop.eup %1736  ;;  %v614_v22 = vpop.f32.mrf.mxu1 }
 0x17b   : > { %v1739_v34 = vpop.eup %1738  ;;  %v881_v44 = vmul.f32 %v2460_v32, %v2435_v30  ;;  %v2479_v51 = vadd.f32 %v614_v22, %v549_v21  ;;  %vm886_vm13 = vweird.f32 %v2460_v32  ;;  %v892_v30 = vor.u32 1.1754944e-38, %v891_v14 }
 0x17c   : > { %v658_v15 = vpop.f32.mrf.mxu2  ;;  %v2482_v57 = vadd.f32 1.0, %v1739_v34  ;;  %v2486_v26 = vpop.eup %1740  ;;  %vm2511_vm14 = vmor %vm885_vm12, %vm886_vm13  ;;  %v904_v22 = vand.u32 2147483647, %v2457_v27  ;;  %v906_v34 = vand.u32 2147483648, %v2457_v27 }
 0x17d   : > { %v723_v16 = vpop.f32.mrf.mxu3  ;;  %v882_v61 = vsub.f32 1.0, %v881_v44  ;;  %v1577_v1 = vmul.f32 -1.442695, %v2479_v51  ;;  %v1743_v7 = vpop.eup %1742  ;;  %v896_v9 = vmul.f32 %v2486_v26, %v2457_v27  ;;  %vm901_vm1 = vweird.f32 %v2486_v26 }
 0x17e   : > { %v724_v41 = vadd.f32 %v723_v16, %v658_v15  ;;  %1744 = vrcp.f32 %v2482_v57  ;;  %v2505_v3 = vadd.f32 1.0, %v1743_v7  ;;  %vm2532_vm2 = vmor %vm900_vm0, %vm901_vm1  ;;  %vm905_vm3 = vcmp.eq.f32.partialorder %v904_v22, 8.507059e+37 }
 0x17f   : > { %v883_v8 = vmul.f32 %v2460_v32, %v882_v61  ;;  %1746 = vpow2.f32 %v1577_v1  ;;  %v897_v16 = vsub.f32 1.0, %v896_v9  ;;  %v907_v27 = vor.u32 1.1754944e-38, %v906_v34 }
 0x180   : > { %v1091_v56 = vmul.f32 %v1075_v43, %v724_v41  ;;  %1748 = vrcp.f32 %v2505_v3  ;;  %vm915_vm4 = vweird.f32 %v2482_v57  ;;  %v919_v1 = vand.u32 2147483647, %v2482_v57 }
 0x181   : > { %v884_v15 = vadd.f32 %v2460_v32, %v883_v8  ;;  %v898_v37 = vmul.f32 %v2486_v26, %v897_v16  ;;  %1750 = vpow2.f32 %v1578_v23  ;;  %v1580_v9 = vmul.f32 -1.442695, %v2358_v53 }
 0x182   : > { %1187 = vmatmul.f32.vlgmr.msrb.gmra.mxu0 %v1091_v56  ;;  %1252 = vmatmul.f32.vlgmr.msrb.gmra.mxu1 %v1091_v56  ;;  %vm920_vm7 = vcmp.eq.f32.partialorder %v919_v1, 8.507059e+37  ;;  %vm930_vm8 = vweird.f32 %v2505_v3  ;;  %v936_v23 = vand.u32 2147483648, %v2505_v3 }
 0x183   : > { %v888_v36 = vsel %vm2511_vm14, %v2460_v32, %v884_v15  ;;  %v899_v32 = vadd.f32 %v2486_v26, %v898_v37  ;;  %v1581_v37 = vmul.f32 -1.442695, %v2371_v2 }
 0x184   : > { %v661_v45 = vpop.f32.mrf.mxu2  ;;  %v2508_v20 = vpop.eup %1744  ;;  %v893_v18 = vsel %vm890_vm15, %v892_v30, %v888_v36 }
 0x185   : > { %v726_v46 = vpop.f32.mrf.mxu3  ;;  %v1747_v35 = vpop.eup %1746  ;;  %v911_v38 = vmul.f32 %v2508_v20, %v2482_v57  ;;  %v1078_v50 = vmul.f32 %v893_v18, %v2404_v42  ;;  %v903_v55 = vsel %vm2532_vm2, %v2486_v26, %v899_v32  ;;  %vm916_vm5 = vweird.f32 %v2508_v20 }
 0x186   : > { %v727_v63 = vadd.f32 %v726_v46, %v661_v45  ;;  %v2527_v43 = vadd.f32 1.0, %v1747_v35  ;;  %v2530_v44 = vpop.eup %1748  ;;  %v1579_v46 = vmul.f32 -1.442695, %v2352_v48  ;;  %v908_v42 = vsel %vm905_vm3, %v907_v27, %v903_v55  ;;  %vm2554_vm6 = vmor %vm915_vm4, %vm916_vm5 }
 0x187   : > { %v912_v47 = vsub.f32 1.0, %v911_v38  ;;  %v1751_v56 = vpop.eup %1750  ;;  %v926_v59 = vmul.f32 %v2530_v44, %v2505_v3  ;;  %v921_v26 = vand.u32 2147483648, %v2482_v57  ;;  %vm931_vm9 = vweird.f32 %v2530_v44 }
 0x188   : > { %v1092_v12 = vmul.f32 %v1076_v4, %v727_v63  ;;  %1752 = vrcp.f32 %v2527_v43  ;;  %v2545_v63 = vadd.f32 1.0, %v1751_v56  ;;  %vm2576_vm10 = vmor %vm930_vm8, %vm931_vm9  ;;  %vm945_vm12 = vweird.f32 %v2527_v43 }
 0x189   : > { %v913_v58 = vmul.f32 %v2508_v20, %v912_v47  ;;  %1754 = vpow2.f32 %v1579_v46  ;;  %v927_v6 = vsub.f32 1.0, %v926_v59  ;;  %v922_v57 = vor.u32 1.1754944e-38, %v921_v26 }
 0x18a   : > { %1190 = vmatmul.f32.gmra.mxu0 %v1092_v12  ;;  %1255 = vmatmul.f32.gmra.mxu1 %v1092_v12  ;;  %1756 = vrcp.f32 %v2545_v63  ;;  %v951_v45 = vand.u32 2147483648, %v2527_v43  ;;  %v1582_v55 = vmul.f32 -1.442695, %v2388_v19  ;;  %vm960_vm1 = vweird.f32 %v2545_v63 }
 0x18b   : > { %v914_v4 = vadd.f32 %v2508_v20, %v913_v58  ;;  %v928_v5 = vmul.f32 %v2530_v44, %v927_v6  ;;  %1758 = vpow2.f32 %v1580_v9  ;;  %v1585_v27 = vmul.f32 -1.442695, %v2431_v0 }
 0x18c   : > { %v664_v10 = vpop.f32.mrf.mxu2 }
 0x18d   : > { %v729_v11 = vpop.f32.mrf.mxu3  ;;  %v918_v12 = vsel %vm2554_vm6, %v2508_v20, %v914_v4  ;;  %v929_v20 = vadd.f32 %v2530_v44, %v928_v5 }
 0x18e   : > { %v730_v17 = vadd.f32 %v729_v11, %v664_v10  ;;  %v2552_v54 = vpop.eup %1752  ;;  %v1079_v10 = vmul.f32 %v908_v42, %v2417_v52 }
 0x18f   : > { %v1755_v11 = vpop.eup %1754  ;;  %v941_v13 = vmul.f32 %v2552_v54, %v2527_v43  ;;  %vm946_vm13 = vweird.f32 %v2552_v54 }
 0x190   : > { %v1093_v40 = vmul.f32 %v1077_v31, %v730_v17  ;;  %v2569_v52 = vadd.f32 1.0, %v1755_v11  ;;  %v923_v17 = vsel %vm920_vm7, %v922_v57, %v918_v12  ;;  %v2572_v28 = vpop.eup %1756  ;;  %v934_v31 = vand.u32 2147483647, %v2505_v3  ;;  %vm2598_vm14 = vmor %vm945_vm12, %vm946_vm13 }
 0x191   : > { %v942_v30 = vsub.f32 1.0, %v941_v13  ;;  %v1080_v38 = vmul.f32 %v923_v17, %v2433_v29  ;;  %v933_v3 = vsel %vm2576_vm10, %v2530_v44, %v929_v20  ;;  %v949_v44 = vand.u32 2147483647, %v2527_v43 }
 0x192   : > { %1193 = vmatmul.f32.gmra.mxu0 %v1093_v40  ;;  %1258 = vmatmul.f32.gmra.mxu1 %v1093_v40  ;;  %v956_v40 = vmul.f32 %v2572_v28, %v2545_v63  ;;  %1760 = vrcp.f32 %v2569_v52  ;;  %vm935_vm11 = vcmp.eq.f32.partialorder %v934_v31, 8.507059e+37  ;;  %vm961_vm0 = vweird.f32 %v2572_v28 }
 0x193   : > { %v943_v18 = vmul.f32 %v2552_v54, %v942_v30  ;;  %1762 = vpow2.f32 %v1581_v37  ;;  %vm950_vm15 = vcmp.eq.f32.partialorder %v949_v44, 8.507059e+37  ;;  %v1583_v57 = vmul.f32 -1.442695, %v2406_v33  ;;  %vm962_vm2 = vmor %vm960_vm1, %vm961_vm0 }
 0x194   : > { %v667_v41 = vpop.f32.mrf.mxu2  ;;  %v957_v29 = vsub.f32 1.0, %v956_v40  ;;  %vm975_vm5 = vweird.f32 %v2569_v52  ;;  %v979_v37 = vand.u32 2147483647, %v2569_v52 }
 0x195   : > { %v732_v21 = vpop.f32.mrf.mxu3  ;;  %v944_v46 = vadd.f32 %v2552_v54, %v943_v18 }
 0x196   : > { %v733_v49 = vadd.f32 %v732_v21, %v667_v41  ;;  %v937_v41 = vor.u32 1.1754944e-38, %v936_v23  ;;  %v1759_v21 = vpop.eup %1758  ;;  %v958_v59 = vmul.f32 %v2572_v28, %v957_v29  ;;  %vm980_vm7 = vcmp.eq.f32.partialorder %v979_v37, 8.507059e+37 }
 0x197   : > { %v2591_v47 = vadd.f32 1.0, %v1759_v21 }
 0x198   : > { %v1094_v60 = vmul.f32 %v1078_v50, %v733_v49  ;;  %v938_v49 = vsel %vm935_vm11, %v937_v41, %v933_v3  ;;  %v2596_v56 = vpop.eup %1760  ;;  %v959_v6 = vadd.f32 %v2572_v28, %v958_v59 }
 0x199   : > { %v1081_v58 = vmul.f32 %v938_v49, %v2453_v24  ;;  %1764 = vrcp.f32 %v2591_v47  ;;  %v971_v43 = vmul.f32 %v2596_v56, %v2569_v52  ;;  %vm976_vm4 = vweird.f32 %v2596_v56 }
 0x19a   : > { %1196 = vmatmul.f32.gmra.mxu0 %v1094_v60  ;;  %1261 = vmatmul.f32.gmra.mxu1 %v1094_v60  ;;  %v952_v60 = vor.u32 1.1754944e-38, %v951_v45  ;;  %1766 = vpow2.f32 %v1582_v55  ;;  %v963_v5 = vsel %vm962_vm2, %v2572_v28, %v959_v6  ;;  %vm977_vm6 = vmor %vm975_vm5, %vm976_vm4  ;;  %v996_v44 = vand.u32 2147483648, %v2591_v47 }
 0x19b   : > { %vm990_vm9 = vweird.f32 %v2591_v47 }
 0x19c   : > { %v670_v61 = vpop.f32.mrf.mxu2 }
 0x19d   : > { %v735_v62 = vpop.f32.mrf.mxu3 }
 0x19e   : > { %v736_v7 = vadd.f32 %v735_v62, %v670_v61  ;;  %v1763_v61 = vpop.eup %1762  ;;  %v948_v62 = vsel %vm2598_vm14, %v2552_v54, %v944_v46  ;;  %v966_v54 = vand.u32 2147483648, %v2545_v63 }
 0x19f   : > { %v2611_v4 = vadd.f32 1.0, %v1763_v61  ;;  %v953_v24 = vsel %vm950_vm15, %v952_v60, %v948_v62  ;;  %v2615_v9 = vpop.eup %1764  ;;  %v997_v62 = vor.u32 1.1754944e-38, %v996_v44 }
 0x1a0   : > { %v1095_v14 = vmul.f32 %v1079_v10, %v736_v7  ;;  %v972_v7 = vsub.f32 1.0, %v971_v43  ;;  %v964_v10 = vand.u32 2147483647, %v2545_v63  ;;  %v1082_v11 = vmul.f32 %v953_v24, %v2479_v51  ;;  %v1767_v12 = vpop.eup %1766 }
 0x1a1   : > { %1768 = vrcp.f32 %v2611_v4  ;;  %v967_v23 = vor.u32 1.1754944e-38, %v966_v54  ;;  %v2627_v20 = vadd.f32 1.0, %v1767_v12  ;;  %vm991_vm8 = vweird.f32 %v2615_v9 }
 0x1a2   : > { %1199 = vmatmul.f32.gmra.mxu0 %v1095_v14  ;;  %1264 = vmatmul.f32.gmra.mxu1 %v1095_v14  ;;  %v973_v13 = vmul.f32 %v2596_v56, %v972_v7  ;;  %v986_v14 = vmul.f32 %v2615_v9, %v2591_v47  ;;  %vm965_vm3 = vcmp.eq.f32.partialorder %v964_v10, 8.507059e+37  ;;  %1770 = vpow2.f32 %v1583_v57  ;;  %vm992_vm10 = vmor %vm990_vm9, %vm991_vm8 }
 0x1a3   : > { %v968_v63 = vsel %vm965_vm3, %v967_v23, %v963_v5  ;;  %1772 = vrcp.f32 %v2627_v20  ;;  %v1011_v7 = vand.u32 2147483648, %v2611_v4  ;;  %vm1005_vm13 = vweird.f32 %v2611_v4 }
 0x1a4   : > { %v673_v15 = vpop.f32.mrf.mxu2  ;;  %v974_v51 = vadd.f32 %v2596_v56, %v973_v13  ;;  %v987_v31 = vsub.f32 1.0, %v986_v14  ;;  %v1083_v36 = vmul.f32 %v968_v63, %v2344_v39  ;;  %v1026_v63 = vand.u32 2147483648, %v2627_v20 }
 0x1a5   : > { %v738_v16 = vpop.f32.mrf.mxu3  ;;  %v1012_v14 = vor.u32 1.1754944e-38, %v1011_v7  ;;  %vm1020_vm1 = vweird.f32 %v2627_v20 }
 0x1a6   : > { %v739_v35 = vadd.f32 %v738_v16, %v673_v15  ;;  %v978_v41 = vsel %vm977_vm6, %v2596_v56, %v974_v51  ;;  %v988_v21 = vmul.f32 %v2615_v9, %v987_v31  ;;  %v994_v56 = vand.u32 2147483647, %v2591_v47 }
 0x1a7   : > { %v2631_v30 = vpop.eup %1768  ;;  %v1024_v31 = vand.u32 2147483647, %v2627_v20 }
 0x1a8   : > { %v1096_v22 = vmul.f32 %v1080_v38, %v739_v35  ;;  %v981_v35 = vand.u32 2147483648, %v2569_v52  ;;  %v1584_v38 = vmul.f32 -1.442695, %v2421_v25  ;;  %v1771_v40 = vpop.eup %1770  ;;  %v1001_v3 = vmul.f32 %v2631_v30, %v2611_v4 }
 0x1a9   : > { %v989_v29 = vadd.f32 %v2615_v9, %v988_v21  ;;  %v2647_v46 = vpop.eup %1772  ;;  %vm995_vm11 = vcmp.eq.f32.partialorder %v994_v56, 8.507059e+37  ;;  %vm1006_vm12 = vweird.f32 %v2631_v30  ;;  %vm1025_vm3 = vcmp.eq.f32.partialorder %v1024_v31, 8.507059e+37  ;;  %v1112_v31 = vld [vmem:[#allocation2 + $0x68] sm:$0xff] }
 0x1aa   : > { %1202 = vmatmul.f32.gmra.mxu0 %v1096_v22  ;;  %1267 = vmatmul.f32.gmra.mxu1 %v1096_v22  ;;  %1774 = vpow2.f32 %v1584_v38  ;;  %v1002_v49 = vsub.f32 1.0, %v1001_v3  ;;  %v1016_v60 = vmul.f32 %v2647_v46, %v2627_v20  ;;  %vm1007_vm14 = vmor %vm1005_vm13, %vm1006_vm12  ;;  %vm1021_vm0 = vweird.f32 %v2647_v46 }
 0x1ab   : > { %vm1022_vm2 = vmor %vm1020_vm1, %vm1021_vm0 }
 0x1ac   : > { %v676_v34 = vpop.f32.mrf.mxu2  ;;  %v1003_v59 = vmul.f32 %v2631_v30, %v1002_v49 }
 0x1ad   : > { %v741_v32 = vpop.f32.mrf.mxu3 }
 0x1ae   : > { %v742_v50 = vadd.f32 %v741_v32, %v676_v34  ;;  %v982_v34 = vor.u32 1.1754944e-38, %v981_v35  ;;  %v2643_v32 = vadd.f32 1.0, %v1771_v40  ;;  %v1027_v40 = vor.u32 1.1754944e-38, %v1026_v63 }
 0x1b0   : > { %v1097_v42 = vmul.f32 %v1081_v58, %v742_v50  ;;  %v983_v52 = vsel %vm980_vm7, %v982_v34, %v978_v41  ;;  %1776 = vrcp.f32 %v2643_v32  ;;  %v1775_v55 = vpop.eup %1774  ;;  %v993_v58 = vsel %vm992_vm10, %v2615_v9, %v989_v29 }
 0x1b1   : > { %v1084_v50 = vmul.f32 %v983_v52, %v2352_v48  ;;  %1778 = vpow2.f32 %v1585_v27  ;;  %v998_v47 = vsel %vm995_vm11, %v997_v62, %v993_v58  ;;  %v1009_v9 = vand.u32 2147483647, %v2611_v4 }
 0x1b2   : > { %1205 = vmatmul.f32.gmra.mxu0 %v1097_v42  ;;  %1270 = vmatmul.f32.gmra.mxu1 %v1097_v42  ;;  %v2659_v42 = vadd.f32 1.0, %v1775_v55  ;;  %vm1035_vm5 = vweird.f32 %v2643_v32 }
 0x1b3   : > { %vm1010_vm15 = vcmp.eq.f32.partialorder %v1009_v9, 8.507059e+37 }
 0x1b4   : > { %v679_v1 = vpop.f32.mrf.mxu2  ;;  %1780 = vrcp.f32 %v2659_v42  ;;  %v1056_v55 = vand.u32 2147483648, %v2659_v42  ;;  %vm1050_vm9 = vweird.f32 %v2659_v42  ;;  %v1054_v58 = vand.u32 2147483647, %v2659_v42 }
 0x1b5   : > { %v744_v26 = vpop.f32.mrf.mxu3 }
 0x1b6   : > { %v745_v8 = vadd.f32 %v744_v26, %v679_v1  ;;  %v1004_v1 = vadd.f32 %v2631_v30, %v1003_v59  ;;  %v1017_v26 = vsub.f32 1.0, %v1016_v60  ;;  %v1777_v6 = vpop.eup %1776  ;;  %v1057_v62 = vor.u32 1.1754944e-38, %v1056_v55 }
 0x1b7   : > { %v1779_v54 = vpop.eup %1778  ;;  %vm1036_vm4 = vweird.f32 %v1777_v6  ;;  %vm1055_vm11 = vcmp.eq.f32.partialorder %v1054_v58, 8.507059e+37  ;;  %v1121_v58 = vld [vmem:[#allocation2 + $0x8] sm:$0xff] }
 0x1b8   : > { %v1098_v15 = vmul.f32 %v1082_v11, %v745_v8  ;;  %v1085_v8 = vmul.f32 %v998_v47, %v2358_v53  ;;  %v1008_v10 = vsel %vm1007_vm14, %v2631_v30, %v1004_v1  ;;  %v1018_v57 = vmul.f32 %v2647_v46, %v1017_v26  ;;  %vm1037_vm6 = vmor %vm1035_vm5, %vm1036_vm4 }
 0x1b9   : > { %v1031_v11 = vmul.f32 %v1777_v6, %v2643_v32  ;;  %v1013_v53 = vsel %vm1010_vm15, %v1012_v14, %v1008_v10 }
 0x1ba   : > { %1208 = vmatmul.f32.gmra.mxu0 %v1098_v15  ;;  %1273 = vmatmul.f32.gmra.mxu1 %v1098_v15  ;;  %v2671_v15 = vadd.f32 1.0, %v1779_v54  ;;  %v1019_v4 = vadd.f32 %v2647_v46, %v1018_v57  ;;  %v1781_v23 = vpop.eup %1780  ;;  %v1086_v51 = vmul.f32 %v1013_v53, %v2371_v2 }
 0x1bb   : > { %v1046_v35 = vmul.f32 %v1781_v23, %v2659_v42  ;;  %vm1051_vm8 = vweird.f32 %v1781_v23 }
 0x1bc   : > { %v682_v16 = vpop.f32.mrf.mxu2  ;;  %1782 = vrcp.f32 %v2671_v15  ;;  %vm1052_vm10 = vmor %vm1050_vm9, %vm1051_vm8  ;;  %vm1065_vm13 = vweird.f32 %v2671_v15  ;;  %v1069_v42 = vand.u32 2147483647, %v2671_v15 }
 0x1bd   : > { %v747_v17 = vpop.f32.mrf.mxu3  ;;  %v1047_v2 = vsub.f32 1.0, %v1046_v35 }
 0x1be   : > { %v748_v28 = vadd.f32 %v747_v17, %v682_v16  ;;  %v1032_v16 = vsub.f32 1.0, %v1031_v11  ;;  %vm1070_vm15 = vcmp.eq.f32.partialorder %v1069_v42, 8.507059e+37  ;;  %v1125_v42 = vld [vmem:[#allocation2 + $0x40] sm:$0xff] }
 0x1bf   : > { %v1048_v52 = vmul.f32 %v1781_v23, %v1047_v2 }
 0x1c0   : > { %v1099_v18 = vmul.f32 %v1083_v36, %v748_v28  ;;  %v1023_v28 = vsel %vm1022_vm2, %v2647_v46, %v1019_v4  ;;  %v1033_v30 = vmul.f32 %v1777_v6, %v1032_v16  ;;  %v1109_v4 = vld [vmem:[#allocation2 + $0xd8] sm:$0xff] }
 0x1c1   : > { %v1028_v41 = vsel %vm1025_vm3, %v1027_v40, %v1023_v28  ;;  %v1049_v56 = vadd.f32 %v1781_v23, %v1048_v52  ;;  %v1110_v16 = vld [vmem:[#allocation2 + $0x18] sm:$0xff]  ;;  %v1117_v52 = vld [vmem:[#allocation2 + $0xe8] sm:$0xff] }
 0x1c2   : > { %1211 = vmatmul.f32.gmra.mxu0 %v1099_v18  ;;  %1276 = vmatmul.f32.gmra.mxu1 %v1099_v18  ;;  %v1034_v21 = vadd.f32 %v1777_v6, %v1033_v30  ;;  %v1783_v3 = vpop.eup %1782  ;;  %v1041_v18 = vand.u32 2147483648, %v2643_v32 }
 0x1c3   : > { %v1061_v29 = vmul.f32 %v1783_v3, %v2671_v15  ;;  %v1053_v59 = vsel %vm1052_vm10, %v1781_v23, %v1049_v56  ;;  %vm1066_vm12 = vweird.f32 %v1783_v3  ;;  %v1120_v56 = vld [vmem:[#allocation2 + $0xf0] sm:$0xff] }
 0x1c4   : > { %v685_v22 = vpop.f32.mrf.mxu2  ;;  %v1038_v34 = vsel %vm1037_vm6, %v1777_v6, %v1034_v21  ;;  %v1042_v44 = vor.u32 1.1754944e-38, %v1041_v18  ;;  %v1058_v47 = vsel %vm1055_vm11, %v1057_v62, %v1053_v59  ;;  %vm1067_vm14 = vmor %vm1065_vm13, %vm1066_vm12  ;;  %v1122_v59 = vld [vmem:[#allocation2 + $0x78] sm:$0xff] }
 0x1c5   : > { %v750_v39 = vpop.f32.mrf.mxu3  ;;  %v1062_v27 = vsub.f32 1.0, %v1061_v29  ;;  %v1118_v29 = vld [vmem:[#allocation2 + $0xb8] sm:$0xff] }
 0x1c6   : > { %v751_v45 = vadd.f32 %v750_v39, %v685_v22  ;;  %v1087_v22 = vmul.f32 %v1028_v41, %v2388_v19  ;;  %v1039_v39 = vand.u32 2147483647, %v2643_v32  ;;  %v1123_v62 = vld [vmem:[#allocation2 + $0x38] sm:$0xff] }
 0x1c7   : > { %v1063_v60 = vmul.f32 %v1783_v3, %v1062_v27 }
 0x1c8   : > { %v1100_v61 = vmul.f32 %v1084_v50, %v751_v45  ;;  %vm1040_vm7 = vcmp.eq.f32.partialorder %v1039_v39, 8.507059e+37 }
 0x1c9   : > { %v1043_v50 = vsel %vm1040_vm7, %v1042_v44, %v1038_v34  ;;  %v1064_v1 = vadd.f32 %v1783_v3, %v1063_v60 }
 0x1ca   : > { %1214 = vmatmul.f32.gmra.mxu0 %v1100_v61  ;;  %1279 = vmatmul.f32.gmra.mxu1 %v1100_v61  ;;  %v1088_v32 = vmul.f32 %v1043_v50, %v2406_v33  ;;  %v1071_v33 = vand.u32 2147483648, %v2671_v15  ;;  %v1119_v50 = vld [vmem:[#allocation2 + $0x60] sm:$0xff] }
 0x1cb   : > { %v1068_v6 = vsel %vm1067_vm14, %v1783_v3, %v1064_v1  ;;  %v1116_v3 = vld [vmem:[#allocation2 + $0x88] sm:$0xff] }
 0x1cc   : > { %v688_v43 = vpop.f32.mrf.mxu2 }
 0x1cd   : > { %v753_v48 = vpop.f32.mrf.mxu3 }
 0x1ce   : > { %v754_v24 = vadd.f32 %v753_v48, %v688_v43 }
 0x1d0   : > { %v1101_v12 = vmul.f32 %v1085_v8, %v754_v24  ;;  %v1089_v24 = vmul.f32 %v1058_v47, %v2421_v25  ;;  %v1072_v8 = vor.u32 1.1754944e-38, %v1071_v33  ;;  %v1107_v25 = vld [vmem:[#allocation2 + $0xb0] sm:$0xff]  ;;  %v1124_v47 = vld [vmem:[#allocation2 + $0x58] sm:$0xff] }
 0x1d2   : > { %1217 = vmatmul.f32.gmra.mxu0 %v1101_v12  ;;  %1282 = vmatmul.f32.gmra.mxu1 %v1101_v12  ;;  %v1073_v10 = vsel %vm1070_vm15, %v1072_v8, %v1068_v6  ;;  %v1126_v6 = vld [vmem:[#allocation2 + $0xc8] sm:$0xff] }
 0x1d3   : > { %v1090_v11 = vmul.f32 %v1073_v10, %v2431_v0  ;;  %v1111_v0 = vld [vmem:[#allocation2 + $0x50] sm:$0xff]  ;;  %v1127_v10 = vld [vmem:[#allocation2 + $0xe0] sm:$0xff] }
 0x1d4   : > { %v691_v5 = vpop.f32.mrf.mxu2 }
 0x1d5   : > { %v756_v13 = vpop.f32.mrf.mxu3 }
 0x1d6   : > { %v757_v17 = vadd.f32 %v756_v13, %v691_v5  ;;  %v1108_v5 = vld [vmem:[#allocation2] sm:$0xff] }
 0x1d8   : > { %v1102_v36 = vmul.f32 %v1086_v51, %v757_v17 }
 0x1da   : > { %1220 = vmatmul.f32.gmra.mxu0 %v1102_v36  ;;  %1285 = vmatmul.f32.gmra.mxu1 %v1102_v36 }
 0x1dc   : > { %v694_v37 = vpop.f32.mrf.mxu2 }
 0x1dd   : > { %v759_v38 = vpop.f32.mrf.mxu3 }
 0x1de   : > { %v760_v20 = vadd.f32 %v759_v38, %v694_v37  ;;  %v1113_v37 = vld [vmem:[#allocation2 + $0x30] sm:$0xff]  ;;  %v1114_v38 = vld [vmem:[#allocation2 + $0x48] sm:$0xff] }
 0x1e0   : > { %v1103_v49 = vmul.f32 %v1087_v22, %v760_v20  ;;  %v1115_v20 = vld [vmem:[#allocation2 + $0x80] sm:$0xff] }
 0x1e2   : > { %1223 = vmatmul.f32.gmra.mxu0 %v1103_v49  ;;  %1288 = vmatmul.f32.gmra.mxu1 %v1103_v49 }
 0x1e4   : > { %v697_v45 = vpop.f32.mrf.mxu2 }
 0x1e5   : > { %v762_v46 = vpop.f32.mrf.mxu3 }
 0x1e6   : > { %v763_v19 = vadd.f32 %v762_v46, %v697_v45 }
 0x1e8   : > { %v1104_v61 = vmul.f32 %v1088_v32, %v763_v19 }
 0x1ea   : > { %1226 = vmatmul.f32.gmra.mxu0 %v1104_v61  ;;  %1291 = vmatmul.f32.gmra.mxu1 %v1104_v61 }
 0x1ec   : > { %v700_v43 = vpop.f32.mrf.mxu2 }
 0x1ed   : > { %v765_v48 = vpop.f32.mrf.mxu3 }
 0x1ee   : > { %v766_v26 = vadd.f32 %v765_v48, %v700_v43 }
 0x1f0   : > { %v1105_v7 = vmul.f32 %v1089_v24, %v766_v26 }
 0x1f2   : > { %1229 = vmatmul.f32.gmra.mxu0 %v1105_v7  ;;  %1294 = vmatmul.f32.gmra.mxu1 %v1105_v7 }
 0x1f4   : > { %v703_v9 = vpop.f32.mrf.mxu2 }
 0x1f5   : > { %v768_v54 = vpop.f32.mrf.mxu3 }
 0x1f6   : > { %v769_v57 = vadd.f32 %v768_v54, %v703_v9 }
 0x1f8   : > { %v1106_v12 = vmul.f32 %v1090_v11, %v769_v57  ;;  %v1128_v57 = vld [vmem:[#allocation2 + $0x90] sm:$0xff] }
 0x1fa   : > { %1232 = vmatmul.f32.gmra.mxu0 %v1106_v12  ;;  %1297 = vmatmul.f32.gmra.mxu1 %v1106_v12 }
 0x1ff   : > { %v1188_v13 = vpop.f32.mrf.mxu0  ;;  %v1253_v14 = vpop.f32.mrf.mxu1 }
 0x200   : > { %v1301_v53 = vadd.f32 %v1188_v13, %v1107_v25  ;;  %v1302_v15 = vadd.f32 %v1253_v14, %v1108_v5  ;;  %v1129_v13 = vld [vmem:[#allocation2 + $0x70] sm:$0xff]  ;;  %v1130_v14 = vld [vmem:[#allocation2 + $0xc0] sm:$0xff] }
 0x202   : > { %1333 = vst [vmem:[#allocation2 + $0xb0] sm:$0xff] %v1301_v53 }
 0x203   : > { %1334 = vst [vmem:[#allocation2] sm:$0xff] %v1302_v15 }
 0x207   : > { %v1191_v17 = vpop.f32.mrf.mxu0  ;;  %v1256_v23 = vpop.f32.mrf.mxu1 }
 0x208   : > { %v1303_v63 = vadd.f32 %v1191_v17, %v1109_v4  ;;  %v1304_v51 = vadd.f32 %v1256_v23, %v1110_v16  ;;  %v1131_v17 = vld [vmem:[#allocation2 + $0xa8] sm:$0xff]  ;;  %v1132_v23 = vld [vmem:[#allocation2 + $0xd0] sm:$0xff] }
 0x20a   : > { %1335 = vst [vmem:[#allocation2 + $0xd8] sm:$0xff] %v1303_v63 }
 0x20b   : > { %1336 = vst [vmem:[#allocation2 + $0x18] sm:$0xff] %v1304_v51 }
 0x20f   : > { %v1194_v28 = vpop.f32.mrf.mxu0  ;;  %v1259_v30 = vpop.f32.mrf.mxu1 }
 0x210   : > { %v1305_v35 = vadd.f32 %v1194_v28, %v1111_v0  ;;  %v1306_v36 = vadd.f32 %v1259_v30, %v1112_v31  ;;  %v1133_v28 = vld [vmem:[#allocation2 + $0x10] sm:$0xff]  ;;  %v1134_v30 = vld [vmem:[#allocation2 + $0x28] sm:$0xff] }
 0x212   : > { %1337 = vst [vmem:[#allocation2 + $0x50] sm:$0xff] %v1305_v35 }
 0x213   : > { %1338 = vst [vmem:[#allocation2 + $0x68] sm:$0xff] %v1306_v36 }
 0x217   : > { %v1197_v40 = vpop.f32.mrf.mxu0  ;;  %v1262_v41 = vpop.f32.mrf.mxu1 }
 0x218   : > { %v1307_v21 = vadd.f32 %v1197_v40, %v1113_v37  ;;  %v1308_v2 = vadd.f32 %v1262_v41, %v1114_v38  ;;  %v1135_v40 = vld [vmem:[#allocation2 + $0xa0] sm:$0xff]  ;;  %v1136_v41 = vld [vmem:[#allocation2 + $0xf8] sm:$0xff] }
 0x21a   : > { %1339 = vst [vmem:[#allocation2 + $0x30] sm:$0xff] %v1307_v21 }
 0x21b   : > { %1340 = vst [vmem:[#allocation2 + $0x48] sm:$0xff] %v1308_v2 }
 0x21f   : > { %v1200_v18 = vpop.f32.mrf.mxu0  ;;  %v1265_v22 = vpop.f32.mrf.mxu1 }
 0x220   : > { %v1309_v39 = vadd.f32 %v1200_v18, %v1115_v20  ;;  %v1310_v34 = vadd.f32 %v1265_v22, %v1116_v3  ;;  %v1137_v18 = vld [vmem:[#allocation2 + $0x20] sm:$0xff]  ;;  %v1138_v22 = vld [vmem:[#allocation2 + $0x98] sm:$0xff] }
 0x222   : > { %1341 = vst [vmem:[#allocation2 + $0x80] sm:$0xff] %v1309_v39 }
 0x223   : > { %1342 = vst [vmem:[#allocation2 + $0x88] sm:$0xff] %v1310_v34 }
 0x227   : > { %v1203_v49 = vpop.f32.mrf.mxu0  ;;  %v1268_v45 = vpop.f32.mrf.mxu1 }
 0x228   : > { %v1311_v46 = vadd.f32 %v1203_v49, %v1117_v52  ;;  %v1312_v44 = vadd.f32 %v1268_v45, %v1118_v29 }
 0x22a   : > { %1343 = vst [vmem:[#allocation2 + $0xe8] sm:$0xff] %v1311_v46 }
 0x22b   : > { %1344 = vst [vmem:[#allocation2 + $0xb8] sm:$0xff] %v1312_v44 }
 0x22f   : > { %v1206_v27 = vpop.f32.mrf.mxu0  ;;  %v1271_v19 = vpop.f32.mrf.mxu1 }
 0x230   : > { %v1313_v55 = vadd.f32 %v1206_v27, %v1119_v50  ;;  %v1314_v32 = vadd.f32 %v1271_v19, %v1120_v56 }
 0x232   : > { %1345 = vst [vmem:[#allocation2 + $0x60] sm:$0xff] %v1313_v55 }
 0x233   : > { %1346 = vst [vmem:[#allocation2 + $0xf0] sm:$0xff] %v1314_v32 }
 0x237   : > { %v1209_v60 = vpop.f32.mrf.mxu0  ;;  %v1274_v61 = vpop.f32.mrf.mxu1 }
 0x238   : > { %v1315_v43 = vadd.f32 %v1209_v60, %v1121_v58  ;;  %v1316_v48 = vadd.f32 %v1274_v61, %v1122_v59 }
 0x23a   : > { %1347 = vst [vmem:[#allocation2 + $0x8] sm:$0xff] %v1315_v43 }
 0x23b   : > { %1348 = vst [vmem:[#allocation2 + $0x78] sm:$0xff] %v1316_v48 }
 0x23f   : > { %v1212_v1 = vpop.f32.mrf.mxu0  ;;  %v1277_v26 = vpop.f32.mrf.mxu1 }
 0x240   : > { %v1317_v33 = vadd.f32 %v1212_v1, %v1123_v62  ;;  %v1318_v24 = vadd.f32 %v1277_v26, %v1124_v47 }
 0x242   : > { %1349 = vst [vmem:[#allocation2 + $0x38] sm:$0xff] %v1317_v33 }
 0x243   : > { %1350 = vst [vmem:[#allocation2 + $0x58] sm:$0xff] %v1318_v24 }
 0x247   : > { %v1215_v7 = vpop.f32.mrf.mxu0  ;;  %v1280_v8 = vpop.f32.mrf.mxu1 }
 0x248   : > { %v1319_v9 = vadd.f32 %v1215_v7, %v1125_v42  ;;  %v1320_v54 = vadd.f32 %v1280_v8, %v1126_v6 }
 0x24a   : > { %1351 = vst [vmem:[#allocation2 + $0x40] sm:$0xff] %v1319_v9 }
 0x24b   : > { %1352 = vst [vmem:[#allocation2 + $0xc8] sm:$0xff] %v1320_v54 }
 0x24f   : > { %v1218_v11 = vpop.f32.mrf.mxu0  ;;  %v1283_v12 = vpop.f32.mrf.mxu1 }
 0x250   : > { %v1321_v25 = vadd.f32 %v1218_v11, %v1127_v10  ;;  %v1322_v5 = vadd.f32 %v1283_v12, %v1128_v57 }
 0x252   : > { %1353 = vst [vmem:[#allocation2 + $0xe0] sm:$0xff] %v1321_v25 }
 0x253   : > { %1354 = vst [vmem:[#allocation2 + $0x90] sm:$0xff] %v1322_v5 }
 0x257   : > { %v1221_v53 = vpop.f32.mrf.mxu0  ;;  %v1286_v15 = vpop.f32.mrf.mxu1 }
 0x258   : > { %v1323_v4 = vadd.f32 %v1221_v53, %v1129_v13  ;;  %v1324_v16 = vadd.f32 %v1286_v15, %v1130_v14 }
 0x25a   : > { %1355 = vst [vmem:[#allocation2 + $0x70] sm:$0xff] %v1323_v4 }
 0x25b   : > { %1356 = vst [vmem:[#allocation2 + $0xc0] sm:$0xff] %v1324_v16 }
 0x25f   : > { %v1224_v63 = vpop.f32.mrf.mxu0  ;;  %v1289_v51 = vpop.f32.mrf.mxu1 }
 0x260   : > { %v1325_v0 = vadd.f32 %v1224_v63, %v1131_v17  ;;  %v1326_v31 = vadd.f32 %v1289_v51, %v1132_v23 }
 0x262   : > { %1357 = vst [vmem:[#allocation2 + $0xa8] sm:$0xff] %v1325_v0 }
 0x263   : > { %1358 = vst [vmem:[#allocation2 + $0xd0] sm:$0xff] %v1326_v31 }
 0x267   : > { %v1227_v35 = vpop.f32.mrf.mxu0  ;;  %v1292_v36 = vpop.f32.mrf.mxu1 }
 0x268   : > { %v1327_v37 = vadd.f32 %v1227_v35, %v1133_v28  ;;  %v1328_v38 = vadd.f32 %v1292_v36, %v1134_v30 }
 0x26a   : > { %1359 = vst [vmem:[#allocation2 + $0x10] sm:$0xff] %v1327_v37 }
 0x26b   : > { %1360 = vst [vmem:[#allocation2 + $0x28] sm:$0xff] %v1328_v38 }
 0x26f   : > { %v1230_v21 = vpop.f32.mrf.mxu0  ;;  %v1295_v2 = vpop.f32.mrf.mxu1 }
 0x270   : > { %v1329_v20 = vadd.f32 %v1230_v21, %v1135_v40  ;;  %v1330_v3 = vadd.f32 %v1295_v2, %v1136_v41 }
 0x272   : > { %1361 = vst [vmem:[#allocation2 + $0xa0] sm:$0xff] %v1329_v20 }
 0x273   : > { %1362 = vst [vmem:[#allocation2 + $0xf8] sm:$0xff] %v1330_v3 }
 0x277   : > { %v1233_v39 = vpop.f32.mrf.mxu0  ;;  %v1298_v34 = vpop.f32.mrf.mxu1  ;;  %1368 = sbr.rel (%p1586_p6) target bundleno = 669 (0x29d), region = 63 }
 0x278   : > { %v1331_v52 = vadd.f32 %v1233_v39, %v1137_v18  ;;  %v1332_v29 = vadd.f32 %v1298_v34, %v1138_v22 }
 0x27a   : > { %1363 = vst [vmem:[#allocation2 + $0x20] sm:$0xff] %v1331_v52 }
 0x27b   : > { %1364 = vst [vmem:[#allocation2 + $0x98] sm:$0xff] %v1332_v29 }
 0x27c   : > { %v1369_v49 = vld [vmem:[#allocation2 + $0xb0] sm:$0xff]  ;;  %v1370_v45 = vld [vmem:[#allocation2] sm:$0xff]  ;;  %v1371_v46 = vld [vmem:[#allocation2 + $0xd8] sm:$0xff] }
 0x27d   : > { %1401 = vst [vmem:[%s2169_s28] sm:$0xff] %v1369_v49  ;;  %v1372_v44 = vld [vmem:[#allocation2 + $0x18] sm:$0xff]  ;;  %v1373_v50 = vld [vmem:[#allocation2 + $0x50] sm:$0xff]  ;;  %v1374_v56 = vld [vmem:[#allocation2 + $0x68] sm:$0xff] }
 0x27e   : > { %1402 = vst [vmem:[%s2169_s28 + $0x8] sm:$0xff] %v1370_v45  ;;  %v1375_v27 = vld [vmem:[#allocation2 + $0x30] sm:$0xff]  ;;  %v1376_v19 = vld [vmem:[#allocation2 + $0x48] sm:$0xff]  ;;  %v1377_v55 = vld [vmem:[#allocation2 + $0x80] sm:$0xff] }
 0x27f   : > { %1403 = vst [vmem:[%s2169_s28 + $0x10] sm:$0xff] %v1371_v46  ;;  %v1378_v32 = vld [vmem:[#allocation2 + $0x88] sm:$0xff]  ;;  %v1380_v59 = vld [vmem:[#allocation2 + $0xb8] sm:$0xff]  ;;  %v1381_v60 = vld [vmem:[#allocation2 + $0x60] sm:$0xff] }
 0x280   : > { %1404 = vst [vmem:[%s2169_s28 + $0x18] sm:$0xff] %v1372_v44  ;;  %v1379_v58 = vld [vmem:[#allocation2 + $0xe8] sm:$0xff]  ;;  %v1382_v61 = vld [vmem:[#allocation2 + $0xf0] sm:$0xff]  ;;  %v1384_v48 = vld [vmem:[#allocation2 + $0x78] sm:$0xff] }
 0x281   : > { %1405 = vst [vmem:[%s2169_s28 + $0x20] sm:$0xff] %v1373_v50  ;;  %v1383_v43 = vld [vmem:[#allocation2 + $0x8] sm:$0xff]  ;;  %v1385_v62 = vld [vmem:[#allocation2 + $0x38] sm:$0xff]  ;;  %v1387_v1 = vld [vmem:[#allocation2 + $0x40] sm:$0xff] }
 0x282   : > { %1406 = vst [vmem:[%s2169_s28 + $0x28] sm:$0xff] %v1374_v56  ;;  %v1386_v47 = vld [vmem:[#allocation2 + $0x58] sm:$0xff]  ;;  %v1388_v26 = vld [vmem:[#allocation2 + $0xc8] sm:$0xff]  ;;  %v1389_v33 = vld [vmem:[#allocation2 + $0xe0] sm:$0xff] }
 0x283   : > { %1407 = vst [vmem:[%s2169_s28 + $0x30] sm:$0xff] %v1375_v27  ;;  %v1390_v24 = vld [vmem:[#allocation2 + $0x90] sm:$0xff]  ;;  %v1392_v6 = vld [vmem:[#allocation2 + $0xc0] sm:$0xff]  ;;  %v1393_v7 = vld [vmem:[#allocation2 + $0xa8] sm:$0xff] }
 0x284   : > { %1408 = vst [vmem:[%s2169_s28 + $0x38] sm:$0xff] %v1376_v19  ;;  %v1391_v42 = vld [vmem:[#allocation2 + $0x70] sm:$0xff]  ;;  %v1396_v54 = vld [vmem:[#allocation2 + $0x28] sm:$0xff]  ;;  %v1397_v10 = vld [vmem:[#allocation2 + $0xa0] sm:$0xff] }
 0x285   : > { %1409 = vst [vmem:[%s2169_s28 + $0x40] sm:$0xff] %v1377_v55  ;;  %v1394_v8 = vld [vmem:[#allocation2 + $0xd0] sm:$0xff]  ;;  %v1398_v57 = vld [vmem:[#allocation2 + $0xf8] sm:$0xff]  ;;  %v1399_v11 = vld [vmem:[#allocation2 + $0x20] sm:$0xff] }
 0x286   : > { %1410 = vst [vmem:[%s2169_s28 + $0x48] sm:$0xff] %v1378_v32  ;;  %v1395_v9 = vld [vmem:[#allocation2 + $0x10] sm:$0xff]  ;;  %v1400_v12 = vld [vmem:[#allocation2 + $0x98] sm:$0xff] }
 0x287   : > { %1411 = vst [vmem:[%s2169_s28 + $0x50] sm:$0xff] %v1379_v58 }
 0x288   : > { %1412 = vst [vmem:[%s2169_s28 + $0x58] sm:$0xff] %v1380_v59 }
 0x289   : > { %1413 = vst [vmem:[%s2169_s28 + $0x60] sm:$0xff] %v1381_v60 }
 0x28a   : > { %1414 = vst [vmem:[%s2169_s28 + $0x68] sm:$0xff] %v1382_v61 }
 0x28b   : > { %1415 = vst [vmem:[%s2169_s28 + $0x70] sm:$0xff] %v1383_v43 }
 0x28c   : > { %1416 = vst [vmem:[%s2169_s28 + $0x78] sm:$0xff] %v1384_v48 }
 0x28d   : > { %1417 = vst [vmem:[%s2169_s28 + $0x80] sm:$0xff] %v1385_v62 }
 0x28e   : > { %1418 = vst [vmem:[%s2169_s28 + $0x88] sm:$0xff] %v1386_v47 }
 0x28f   : > { %1419 = vst [vmem:[%s2169_s28 + $0x90] sm:$0xff] %v1387_v1 }
 0x290   : > { %1420 = vst [vmem:[%s2169_s28 + $0x98] sm:$0xff] %v1388_v26 }
 0x291   : > { %1421 = vst [vmem:[%s2169_s28 + $0xa0] sm:$0xff] %v1389_v33 }
 0x292   : > { %1422 = vst [vmem:[%s2169_s28 + $0xa8] sm:$0xff] %v1390_v24 }
 0x293   : > { %1423 = vst [vmem:[%s2169_s28 + $0xb0] sm:$0xff] %v1391_v42 }
 0x294   : > { %1424 = vst [vmem:[%s2169_s28 + $0xb8] sm:$0xff] %v1392_v6 }
 0x295   : > { %1425 = vst [vmem:[%s2169_s28 + $0xc0] sm:$0xff] %v1393_v7 }
 0x296   : > { %1426 = vst [vmem:[%s2169_s28 + $0xc8] sm:$0xff] %v1394_v8 }
 0x297   : > { %1427 = vst [vmem:[%s2169_s28 + $0xd0] sm:$0xff] %v1395_v9 }
 0x298   : > { %1428 = vst [vmem:[%s2169_s28 + $0xd8] sm:$0xff] %v1396_v54 }
 0x299   : > { %1429 = vst [vmem:[%s2169_s28 + $0xe0] sm:$0xff] %v1397_v10 }
 0x29a   : > { %1430 = vst [vmem:[%s2169_s28 + $0xe8] sm:$0xff] %v1398_v57 }
 0x29b   : > { %1431 = vst [vmem:[%s2169_s28 + $0xf0] sm:$0xff] %v1399_v11 }
 0x29c   : > { %1432 = vst [vmem:[%s2169_s28 + $0xf8] sm:$0xff] %v1400_v12 }
 0x29d PF: > { %s1597_s1 = sshll.u32 %s1882_s18, 8  ;;  %s1447_s4 = sshll.u32 %s2169_s28, 4  ;;  %s1448_s4 = int_to_ptr.vmem [resolvable:$true] %s1447_s4 }
 0x29e   : > { %s1446_s29 = scalar_lea.hbm %s2783_s3, %s1597_s1  ;;  %s2808_s9 = sand.u32 1, %s1862_s13  }
 0x29f   : > { %s1449_s8 = sshll.u32 %s1446_s29, 4  ;;  %s1434_s10 = scalar_lea.sflag [#allocation5], %s2808_s9  ;;  %s1450_s8 = int_to_ptr.hbm [resolvable:$true] %s1449_s8 }
 0x2a0   : > { %s1798_s11 = sshra.s32 %s1450_s8, 4  ;;  %s1804_s18 = scalar_lea.hbm %s2783_s3, 512  ;;  %s1799_s11 = int_to_ptr.hbm [resolvable:$true] %s1798_s11 }
 0x2a1   : > { %s1800_s22 = scalar_lea.hbm %s1799_s11, 256  ;;  %p1805_p11 = scmp.lt.s32.totalorder %s1799_s11, %s2783_s3 }
 0x2a2   : > { %p1801_p7 = scmp.ne.s32.totalorder %s1799_s11, %s1800_s22  ;;  %p1806_p13 = scmp.lt.s32.totalorder %s1804_s18, %s1800_s22 }
 0x2a4   : > { %p1802_p8 = pnand %p1801_p7, %p1998_p10  ;;  %p1807_p0 = por %p1806_p13, %p1805_p11 }
 0x2a6   : > { %p1803_p9 = pneg %p1802_p8 }
 0x2a8   : > { %p1808_p1 = pnand %p1807_p0, %p1803_p9 }
 0x2aa   : > { %1811 = shalt.err (!%p1808_p1)
}
 0x2ab   : > { %s1897_s28 = smov 256   ;;  %s1898_s1 = smov 16  }
 0x2ac   : > { %1630 = dma.vmem_to_hbm [thread:$0]  (%p1998_p10), %s1448_s4, 4096, %s1450_s8, %s1434_s10, %s1897_s28, %s1897_s28, %s1898_s1  }
 0x2ad PF: > { %p1636_p2 = scmp.ge.s32.totalorder %s1894_s21, 2  ;;  %s1464_s17 = sand.u32 1, %s1858_s12  }
 0x2ae   : > { %s1465_s25 = scalar_lea.sflag [#allocation5], %s1464_s17 }
 0x2af   : > { %p1633_p3 = pnand %p1636_p2, %p2005_p12 }
 0x2b1   : > { %p1634_p4 = pneg %p1633_p3 }
 0x2b3   : > { %1853 = dma.done.wait (%p1634_p4), %s1465_s25, 4096  }
 0x2b4   : > { %1855 = vsyncadd (%p1634_p4), %s1465_s25, 4294963200  ;;  %s16_s21 = sadd.s32 1, %s1894_s21   ;;  %s2809_s5 = sld [smem:[#allocation7_spill]] }
 0x2b5   : > { %p13_p5 = scmp.ge.s32.totalorder %s16_s21, 10   ;;  %s2810_s12 = smov %s1862_s13 }
 0x2b6   : > { %s2811_s13 = smov %s1866_s14  ;;  %s2812_s14 = smov %s2003_s6 }
 0x2b7   : > { %s2813_s15 = smov %s1874_s16  ;;  %s2814_s16 = smov %s1992_s30 }
 0x2b8   : > { %s2815_s17 = smov %s1886_s19  ;;  %s2816_s18 = smov %s1890_s20 }
 0x2b9   : > { %s2817_s19 = smov %s2820_s24  ;;  %15 = sbr.rel (!%p13_p5) target bundleno = 8 (0x8), region = 109 }
 0x2ba   : > { %s2818_s20 = smov %s2809_s5 }
 0x2be   :  { %1471 = vsyncpa [#allocation5], 1 }
 0x2bf   :  { %1473 = vsyncpa [#allocation5 + $0x1], 1 }

</bundles_post_ra>
